<compile_context>
chip_gen: v7x
topology: tpu7x:2x2x1
jax: 0.10.0
libtpu: 0.0.40
codegen_flags: <defaults>
</compile_context>

<pallas_src>
import functools

import numpy as np
import jax
import jax.numpy as jnp
from jax.experimental import pallas as pl
from jax.experimental.pallas import tpu as pltpu


def _round_up(x, m):
    return (x + m - 1) // m * m


# ----------------------------------------------------------------------------
# Pallas kernel: grid = (batch_blocks, time_chunks); hidden state carried in
# VMEM scratch; weights single-buffered via one-shot DMA; capped-unroll inner
# loop over the chunk; regressor head fused into the last time chunk.
# ----------------------------------------------------------------------------
def _gru_classifier_kernel(Hp, Cp, T, seq_len, padded_len,
                           gi_ref, whh_hbm, misc_hbm, wlin_hbm,
                           out_ref,
                           h_ref, whh_vmem, misc_vmem, wlin_vmem):
    c = pl.program_id(1)                      # time-chunk index (sequential)

    @pl.when(c == 0)
    def _init():
        # past_state = zeros([1, B, H]); also single-buffer the recurrent
        # weights + small params (one DMA per batch block, not per grid step).
        h_ref[...] = jnp.zeros_like(h_ref)
        pltpu.sync_copy(whh_hbm, whh_vmem)
        pltpu.sync_copy(misc_hbm, misc_vmem)

    b_hh_n = misc_vmem[0:1, :Hp]              # (1, Hp): only the n-gate b_hh

    def step(i, h):
        gi = gi_ref[i].astype(jnp.float32)    # (BB, 3*Hp), precomputed x-proj
        whh = whh_vmem[...]                   # re-read from VMEM (cheap), not
        gh = jnp.dot(h.astype(whh.dtype), whh,  # pinned in vregs across steps
                     preferred_element_type=jnp.float32)
        # PyTorch GRU gate order (r, z, n); gate blocks are 128-lane aligned.
        rz = jax.nn.sigmoid(gi[:, :2 * Hp] + gh[:, :2 * Hp])   # fused r,z
        r = rz[:, :Hp]
        z = rz[:, Hp:]
        n = jnp.tanh(gi[:, 2 * Hp:] + r * (gh[:, 2 * Hp:] + b_hh_n))
        h_new = n + z * (h - n)               # == (1-z)*n + z*h, one op fewer
        if padded_len > seq_len:              # static: only if tail padding
            h_new = jnp.where(c * T + i < seq_len, h_new, h)
        return h_new

    h = jax.lax.fori_loop(0, T, step, h_ref[...], unroll=min(8, T))
    h_ref[...] = h

    @pl.when(c == pl.num_programs(1) - 1)
    def _finalize():
        # W_lin is used exactly once: fetch it only now (not resident during
        # the steady-state recurrence).
        pltpu.sync_copy(wlin_hbm, wlin_vmem)
        bn_a = misc_vmem[1:2, :Hp]
        bn_b = misc_vmem[2:3, :Hp]
        b_lin = misc_vmem[3:4, :Cp]
        xb = jnp.maximum(h_ref[...] * bn_a + bn_b, 0.0)   # BN(eval)+ReLU(+Dropout=id)
        wlin = wlin_vmem[...]
        out_ref[...] = (jnp.dot(xb.astype(wlin.dtype), wlin,
                                preferred_element_type=jnp.float32)
                        + b_lin).astype(out_ref.dtype)


# ----------------------------------------------------------------------------
# Wrapper: pad/align, precompute the input projection (one big matmul that
# writes the padded, time-major, gate-blocked layout directly), call kernel.
# ----------------------------------------------------------------------------
def lstm_classifier_forward(x_bsf, params, hidden_size, n_state,
                            time_chunk=None, batch_block=None,
                            stream_dtype=jnp.float32,
                            vmem_budget_bytes=36 * 1024 * 1024):
    """x_bsf: (batch, seq, feature) float32, matching the PyTorch batch_first input."""
    B, S, F = x_bsf.shape
    H = hidden_size
    f32 = jnp.float32
    elem = np.dtype(stream_dtype).itemsize

    Hp = _round_up(H, 128)            # lane-aligned hidden size
    Cp = _round_up(n_state, 128)      # lane-dense classifier output
    L = max(Hp, Cp)

    sub = 8 if elem >= 4 else 16      # sublane granularity (f32: 8, bf16: 16)
    Bp = _round_up(B, sub)
    BB = Bp if batch_block is None else _round_up(min(batch_block, Bp), sub)
    num_bb = -(-Bp // BB)
    Bp = num_bb * BB

    # --- derive the time chunk from a VMEM budget unless given explicitly ---
    fixed_bytes = ((Hp * 3 * Hp + Hp * Cp) * elem          # single-buffered weights
                   + (8 * L + BB * Hp + 2 * BB * Cp) * 4)  # misc, h carry, out
    if time_chunk is None:
        per_t = 2 * BB * 3 * Hp * elem                     # double-buffered gi chunk
        T = int(max(1, min((vmem_budget_bytes - fixed_bytes) // per_t, 64, S)))
    else:
        T = max(1, min(time_chunk, S))
    num_chunks = -(-S // T)
    Sp = num_chunks * T

    # --- gate-blocked, lane-padded input projection weights / bias ----------
    b_ih = params["b_ih"][0]
    b_hh = params["b_hh"][0]
    # fold b_hh_{r,z} into the gi bias (b_hh_n must stay inside the r*(...) term)
    bias3 = (b_ih + jnp.concatenate([b_hh[:2 * H], jnp.zeros((H,), f32)])
             ).reshape(3, H)
    bias_p = jnp.zeros((3, Hp), f32).at[:, :H].set(bias3).reshape(3 * Hp)
    w_ih_p = jnp.zeros((F, 3, Hp), f32).at[:, :, :H].set(
        params["w_ih_t"].reshape(F, 3, H)).reshape(F, 3 * Hp)

    # pad + transpose the (small) x so the single big matmul writes the padded,
    # time-major, gate-blocked gi directly (no extra HBM passes over gi).
    x_p = jnp.zeros((Sp, Bp, F), f32).at[:S, :B, :].set(
        jnp.transpose(x_bsf, (1, 0, 2)))
    gi_p = (jnp.einsum("sbf,fg->sbg", x_p, w_ih_p) + bias_p).astype(stream_dtype)

    # --- lane-aligned, gate-blocked recurrent weight (Hp, 3*Hp) -------------
    whh_p = jnp.zeros((Hp, 3, Hp), f32).at[:H, :, :H].set(
        params["w_hh_t"].reshape(H, 3, H)).reshape(Hp, 3 * Hp).astype(stream_dtype)

    # --- BN(eval) folded to (scale, shift); pack small vectors in one tile ---
    bn_a = params["gamma"][0] * jax.lax.rsqrt(params["run_var"][0] + 1e-5)
    bn_b = params["beta"][0] - params["run_mean"][0] * bn_a
    misc = jnp.zeros((8, L), f32)
    misc = misc.at[0, :H].set(b_hh[2 * H:])          # b_hh_n
    misc = misc.at[1, :H].set(bn_a)
    misc = misc.at[2, :H].set(bn_b)
    misc = misc.at[3, :n_state].set(params["b_lin"][0])

    wlin_p = jnp.zeros((Hp, Cp), f32).at[:H, :n_state].set(
        params["w_lin_t"]).astype(stream_dtype)

    kernel = functools.partial(_gru_classifier_kernel, Hp, Cp, T, S, Sp)
    grid_spec = pltpu.PrefetchScalarGridSpec(
        num_scalar_prefetch=0,
        grid=(num_bb, num_chunks),            # (parallel batch blocks, sequential time)
        in_specs=[
            pl.BlockSpec((T, BB, 3 * Hp), lambda b, c: (c, b, 0)),  # gi time chunk
            pl.BlockSpec(memory_space=pl.ANY),   # W_hh^T  (one-shot copy in kernel)
            pl.BlockSpec(memory_space=pl.ANY),   # packed small params
            pl.BlockSpec(memory_space=pl.ANY),   # W_lin^T (fetched only at finalize)
        ],
        out_specs=pl.BlockSpec((BB, Cp), lambda b, c: (b, 0)),
        scratch_shapes=[
            pltpu.VMEM((BB, Hp), jnp.float32),        # h carry
            pltpu.VMEM((Hp, 3 * Hp), stream_dtype),   # W_hh single buffer
            pltpu.VMEM((8, L), jnp.float32),          # packed small params
            pltpu.VMEM((Hp, Cp), stream_dtype),       # W_lin single buffer
        ],
    )
    out_p = pl.pallas_call(
        kernel,
        out_shape=jax.ShapeDtypeStruct((Bp, Cp), jnp.float32),
        grid_spec=grid_spec,
        compiler_params=pltpu.CompilerParams(
            dimension_semantics=("parallel", "arbitrary"),
            # 48 MiB is safe on all generations (v7x physical VMEM is 64 MiB);
            # on v5e/v6e (128 MiB) this can be raised to ~96 MiB together with
            # vmem_budget_bytes for even larger time chunks.
            vmem_limit_bytes=48 * 1024 * 1024),
    )(gi_p, whh_p, misc, wlin_p)

    return out_p[:B, :n_state]


# ----------------------------------------------------------------------------
# Pure-JAX reference (same math, unpadded) for a correctness check.
# ----------------------------------------------------------------------------
def reference_forward(x_bsf, params, hidden_size, n_state):
    B, S, F = x_bsf.shape
    H = hidden_size

    def step(h, x_t):
        gi = x_t @ params["w_ih_t"] + params["b_ih"][0]
        gh = h @ params["w_hh_t"] + params["b_hh"][0]
        r = jax.nn.sigmoid(gi[:, :H] + gh[:, :H])
        z = jax.nn.sigmoid(gi[:, H:2 * H] + gh[:, H:2 * H])
        n = jnp.tanh(gi[:, 2 * H:] + r * gh[:, 2 * H:])
        h_new = (1.0 - z) * n + z * h
        return h_new, None

    h0 = jnp.zeros((B, H), jnp.float32)
    h_final, _ = jax.lax.scan(step, h0, jnp.transpose(x_bsf, (1, 0, 2)))
    xb = ((h_final - params["run_mean"][0])
          * jax.lax.rsqrt(params["run_var"][0] + 1e-5)
          * params["gamma"][0] + params["beta"][0])
    xb = jnp.maximum(xb, 0.0)
    return xb @ params["w_lin_t"] + params["b_lin"][0]


def init_params(key, feature_size, hidden_size, n_state):
    H, F, C = hidden_size, feature_size, n_state
    ks = jax.random.split(key, 6)
    s_rnn = 1.0 / jnp.sqrt(H)
    s_lin = 1.0 / jnp.sqrt(H)
    u = lambda k, shape, s: jax.random.uniform(k, shape, jnp.float32, -s, s)
    return {
        # GRU weights stored pre-transposed for matmuls, gate order (r, z, n).
        "w_ih_t": u(ks[0], (F, 3 * H), s_rnn),
        "w_hh_t": u(ks[1], (H, 3 * H), s_rnn),
        "b_ih": u(ks[2], (1, 3 * H), s_rnn),
        "b_hh": u(ks[3], (1, 3 * H), s_rnn),
        # BatchNorm1d default init / fresh running stats (eval mode).
        "gamma": jnp.ones((1, H), jnp.float32),
        "beta": jnp.zeros((1, H), jnp.float32),
        "run_mean": jnp.zeros((1, H), jnp.float32),
        "run_var": jnp.ones((1, H), jnp.float32),
        # Linear(hidden_size, n_state), pre-transposed.
        "w_lin_t": u(ks[4], (H, C), s_lin),
        "b_lin": u(ks[5], (1, C), s_lin),
    }


if __name__ == "__main__":
    feature_size, hidden_size, n_state = 16, 32, 3

    key = jax.random.PRNGKey(0)
    k_x, k_x2, k_p = jax.random.split(key, 3)
    params = init_params(k_p, feature_size, hidden_size, n_state)

    # 1) small batch, seq not a multiple of the chunk -> exercises the padded
    #    tail-timestep carry mask.
    batch, seq = 4, 12
    x = jax.random.normal(k_x, (batch, seq, feature_size), jnp.float32)
    out = lstm_classifier_forward(x, params, hidden_size, n_state, time_chunk=8)
    out = jax.block_until_ready(out)
    ref = reference_forward(x, params, hidden_size, n_state)
    assert out.shape == (batch, n_state), out.shape
    assert jnp.allclose(out, ref, atol=1e-5, rtol=1e-5), (out, ref)

    # 2) larger batch split into batch blocks (v7x "parallel" axis path) with
    #    auto-derived time chunk.
    batch2 = 20
    x2 = jax.random.normal(k_x2, (batch2, seq, feature_size), jnp.float32)
    out2 = lstm_classifier_forward(x2, params, hidden_size, n_state,
                                   batch_block=8)
    out2 = jax.block_until_ready(out2)
    ref2 = reference_forward(x2, params, hidden_size, n_state)
    assert out2.shape == (batch2, n_state), out2.shape
    assert jnp.allclose(out2, ref2, atol=1e-5, rtol=1e-5), (out2, ref2)

    # 3) bf16-streamed gi / weights (v6e/v7x HBM + VMEM saver); f32 gate math,
    #    so only a loose tolerance vs. the f32 reference is expected.
    out_bf = lstm_classifier_forward(x, params, hidden_size, n_state,
                                     time_chunk=8, stream_dtype=jnp.bfloat16)
    out_bf = jax.block_until_ready(out_bf)
    assert jnp.allclose(out_bf, ref, atol=1e-1, rtol=1e-1), (out_bf, ref)

    print("KERNEL_OK")
</pallas_src>

<mosaic_0001>
module attributes {stable_mosaic.version = 11 : i64} {
  func.func @_gru_classifier_kernel(%arg0: i32, %arg1: i32, %arg2: memref<8x8x384xf32, #tpu.memory_space<vmem>>, %arg3: memref<128x384xf32, #tpu.memory_space<any>>, %arg4: memref<8x128xf32, #tpu.memory_space<any>>, %arg5: memref<128x128xf32, #tpu.memory_space<any>>, %arg6: memref<8x128xf32, #tpu.memory_space<vmem>>, %arg7: memref<8x128xf32, #tpu.memory_space<vmem>>, %arg8: memref<128x384xf32, #tpu.memory_space<vmem>>, %arg9: memref<8x128xf32, #tpu.memory_space<vmem>>, %arg10: memref<128x128xf32, #tpu.memory_space<vmem>>) attributes {dimension_semantics = [#tpu.dimension_semantics<parallel>, #tpu.dimension_semantics<arbitrary>], iteration_bounds = array<i64: 1, 2>, scalar_prefetch = 0 : i64, scratch_operands = 4 : i64, tpu.core_type = #tpu.core_type<tc>, window_params = [{transform_indices = @transform_0, window_bounds = array<i64: 8, 8, 384>}, {}, {}, {}, {transform_indices = @transform_4, window_bounds = array<i64: 8, 128>}]} {
    %c0_i32 = arith.constant 0 : i32
    %0 = arith.cmpi eq, %arg1, %c0_i32 : i32
    %1 = arith.extui %0 : i1 to i32
    %c0_i32_0 = arith.constant 0 : i32
    %2 = arith.cmpi ne, %1, %c0_i32_0 : i32
    scf.if %2 {
      %cst_71 = arith.constant 0.000000e+00 : f32
      %241 = vector.broadcast %cst_71 : f32 to vector<8x128xf32>
      %c0_72 = arith.constant 0 : index
      %c0_73 = arith.constant 0 : index
      %242 = vector.load %arg7[%c0_72, %c0_73] : memref<8x128xf32, #tpu.memory_space<vmem>>, vector<8x128xf32>
      tpu.vector_store %arg7[%c0_72, %c0_73], %241 {strides = array<i32>} : memref<8x128xf32, #tpu.memory_space<vmem>>, vector<8x128xf32>,
      "tpu.region"() ({
        %243 = tpu.sem_alloc : memref<!tpu.dma_semaphore, #tpu.memory_space<semaphore_mem>>
        tpu.enqueue_dma source(%arg3 : memref<128x384xf32, #tpu.memory_space<any>>) target(%arg8 : memref<128x384xf32, #tpu.memory_space<vmem>>) target_semaphore(%243 : memref<!tpu.dma_semaphore, #tpu.memory_space<semaphore_mem>>)
        tpu.wait_dma2 semaphore(%243 : memref<!tpu.dma_semaphore, #tpu.memory_space<semaphore_mem>>) src(%arg3 : memref<128x384xf32, #tpu.memory_space<any>>) dst(%arg8 : memref<128x384xf32, #tpu.memory_space<vmem>>)
        tpu.yield
      }) : () -> ()
      "tpu.region"() ({
        %243 = tpu.sem_alloc : memref<!tpu.dma_semaphore, #tpu.memory_space<semaphore_mem>>
        tpu.enqueue_dma source(%arg4 : memref<8x128xf32, #tpu.memory_space<any>>) target(%arg9 : memref<8x128xf32, #tpu.memory_space<vmem>>) target_semaphore(%243 : memref<!tpu.dma_semaphore, #tpu.memory_space<semaphore_mem>>)
        tpu.wait_dma2 semaphore(%243 : memref<!tpu.dma_semaphore, #tpu.memory_space<semaphore_mem>>) src(%arg4 : memref<8x128xf32, #tpu.memory_space<any>>) dst(%arg9 : memref<8x128xf32, #tpu.memory_space<vmem>>)
        tpu.yield
      }) : () -> ()
    } else {
    }
    %c0 = arith.constant 0 : index
    %c0_1 = arith.constant 0 : index
    %3 = vector.load %arg9[%c0, %c0_1] : memref<8x128xf32, #tpu.memory_space<vmem>>, vector<1x128xf32>
    %c0_2 = arith.constant 0 : index
    %c0_3 = arith.constant 0 : index
    %4 = vector.load %arg7[%c0_2, %c0_3] : memref<8x128xf32, #tpu.memory_space<vmem>>, vector<8x128xf32>
    %c0_i32_4 = arith.constant 0 : i32
    %5 = arith.index_cast %c0_i32_4 : i32 to index
    %c0_5 = arith.constant 0 : index
    %c0_6 = arith.constant 0 : index
    %6 = vector.load %arg2[%5, %c0_5, %c0_6] : memref<8x8x384xf32, #tpu.memory_space<vmem>>, vector<1x8x384xf32>
    %7 = vector.shape_cast %6 : vector<1x8x384xf32> to vector<8x384xf32>
    %c0_7 = arith.constant 0 : index
    %c0_8 = arith.constant 0 : index
    %8 = vector.load %arg8[%c0_7, %c0_8] : memref<128x384xf32, #tpu.memory_space<vmem>>, vector<128x384xf32>
    %cst = arith.constant dense<0.000000e+00> : vector<8x384xf32>
    %9 = tpu.matmul %4, %8, %cst {dimension_numbers = #tpu.dot_dimension_numbers<[1], [0], [0], [1], [0, 0, 1, 1], [], []>} : vector<8x128xf32>, vector<128x384xf32>, vector<8x384xf32> -> vector<8x384xf32>
    %10 = vector.extract_strided_slice %7 {offsets = [0, 0], sizes = [8, 256], strides = [1, 1]} : vector<8x384xf32> to vector<8x256xf32>
    %11 = vector.extract_strided_slice %9 {offsets = [0, 0], sizes = [8, 256], strides = [1, 1]} : vector<8x384xf32> to vector<8x256xf32>
    %12 = arith.addf %10, %11 : vector<8x256xf32>
    %13 = arith.negf %12 : vector<8x256xf32>
    %14 = math.exp %13 : vector<8x256xf32>
    %cst_9 = arith.constant 1.000000e+00 : f32
    %15 = vector.broadcast %cst_9 : f32 to vector<8x256xf32>
    %16 = arith.addf %15, %14 : vector<8x256xf32>
    %17 = arith.divf %15, %16 : vector<8x256xf32>
    %18 = vector.extract_strided_slice %17 {offsets = [0, 0], sizes = [8, 128], strides = [1, 1]} : vector<8x256xf32> to vector<8x128xf32>
    %19 = vector.extract_strided_slice %17 {offsets = [0, 128], sizes = [8, 128], strides = [1, 1]} : vector<8x256xf32> to vector<8x128xf32>
    %20 = vector.extract_strided_slice %7 {offsets = [0, 256], sizes = [8, 128], strides = [1, 1]} : vector<8x384xf32> to vector<8x128xf32>
    %21 = vector.extract_strided_slice %9 {offsets = [0, 256], sizes = [8, 128], strides = [1, 1]} : vector<8x384xf32> to vector<8x128xf32>
    %22 = vector.broadcast %3 : vector<1x128xf32> to vector<8x128xf32>
    %23 = arith.addf %21, %22 : vector<8x128xf32>
    %24 = arith.mulf %18, %23 : vector<8x128xf32>
    %25 = arith.addf %20, %24 : vector<8x128xf32>
    %26 = math.tanh %25 : vector<8x128xf32>
    %27 = arith.subf %4, %26 : vector<8x128xf32>
    %28 = arith.mulf %19, %27 : vector<8x128xf32>
    %29 = arith.addf %26, %28 : vector<8x128xf32>
    %c8_i32 = arith.constant 8 : i32
    %30 = arith.muli %arg1, %c8_i32 : i32
    %31 = arith.addi %30, %c0_i32_4 : i32
    %c12_i32 = arith.constant 12 : i32
    %32 = arith.cmpi slt, %31, %c12_i32 : i32
    %33 = arith.select %32, %29, %4 : vector<8x128xf32>
    %c1_i32 = arith.constant 1 : i32
    %34 = arith.index_cast %c1_i32 : i32 to index
    %c0_10 = arith.constant 0 : index
    %c0_11 = arith.constant 0 : index
    %35 = vector.load %arg2[%34, %c0_10, %c0_11] : memref<8x8x384xf32, #tpu.memory_space<vmem>>, vector<1x8x384xf32>
    %36 = vector.shape_cast %35 : vector<1x8x384xf32> to vector<8x384xf32>
    %c0_12 = arith.constant 0 : index
    %c0_13 = arith.constant 0 : index
    %37 = vector.load %arg8[%c0_12, %c0_13] : memref<128x384xf32, #tpu.memory_space<vmem>>, vector<128x384xf32>
    %cst_14 = arith.constant dense<0.000000e+00> : vector<8x384xf32>
    %38 = tpu.matmul %33, %37, %cst_14 {dimension_numbers = #tpu.dot_dimension_numbers<[1], [0], [0], [1], [0, 0, 1, 1], [], []>} : vector<8x128xf32>, vector<128x384xf32>, vector<8x384xf32> -> vector<8x384xf32>
    %39 = vector.extract_strided_slice %36 {offsets = [0, 0], sizes = [8, 256], strides = [1, 1]} : vector<8x384xf32> to vector<8x256xf32>
    %40 = vector.extract_strided_slice %38 {offsets = [0, 0], sizes = [8, 256], strides = [1, 1]} : vector<8x384xf32> to vector<8x256xf32>
    %41 = arith.addf %39, %40 : vector<8x256xf32>
    %42 = arith.negf %41 : vector<8x256xf32>
    %43 = math.exp %42 : vector<8x256xf32>
    %cst_15 = arith.constant 1.000000e+00 : f32
    %44 = vector.broadcast %cst_15 : f32 to vector<8x256xf32>
    %45 = arith.addf %44, %43 : vector<8x256xf32>
    %46 = arith.divf %44, %45 : vector<8x256xf32>
    %47 = vector.extract_strided_slice %46 {offsets = [0, 0], sizes = [8, 128], strides = [1, 1]} : vector<8x256xf32> to vector<8x128xf32>
    %48 = vector.extract_strided_slice %46 {offsets = [0, 128], sizes = [8, 128], strides = [1, 1]} : vector<8x256xf32> to vector<8x128xf32>
    %49 = vector.extract_strided_slice %36 {offsets = [0, 256], sizes = [8, 128], strides = [1, 1]} : vector<8x384xf32> to vector<8x128xf32>
    %50 = vector.extract_strided_slice %38 {offsets = [0, 256], sizes = [8, 128], strides = [1, 1]} : vector<8x384xf32> to vector<8x128xf32>
    %51 = vector.broadcast %3 : vector<1x128xf32> to vector<8x128xf32>
    %52 = arith.addf %50, %51 : vector<8x128xf32>
    %53 = arith.mulf %47, %52 : vector<8x128xf32>
    %54 = arith.addf %49, %53 : vector<8x128xf32>
    %55 = math.tanh %54 : vector<8x128xf32>
    %56 = arith.subf %33, %55 : vector<8x128xf32>
    %57 = arith.mulf %48, %56 : vector<8x128xf32>
    %58 = arith.addf %55, %57 : vector<8x128xf32>
    %c8_i32_16 = arith.constant 8 : i32
    %59 = arith.muli %arg1, %c8_i32_16 : i32
    %60 = arith.addi %59, %c1_i32 : i32
    %c12_i32_17 = arith.constant 12 : i32
    %61 = arith.cmpi slt, %60, %c12_i32_17 : i32
    %62 = arith.select %61, %58, %33 : vector<8x128xf32>
    %c2_i32 = arith.constant 2 : i32
    %63 = arith.index_cast %c2_i32 : i32 to index
    %c0_18 = arith.constant 0 : index
    %c0_19 = arith.constant 0 : index
    %64 = vector.load %arg2[%63, %c0_18, %c0_19] : memref<8x8x384xf32, #tpu.memory_space<vmem>>, vector<1x8x384xf32>
    %65 = vector.shape_cast %64 : vector<1x8x384xf32> to vector<8x384xf32>
    %c0_20 = arith.constant 0 : index
    %c0_21 = arith.constant 0 : index
    %66 = vector.load %arg8[%c0_20, %c0_21] : memref<128x384xf32, #tpu.memory_space<vmem>>, vector<128x384xf32>
    %cst_22 = arith.constant dense<0.000000e+00> : vector<8x384xf32>
    %67 = tpu.matmul %62, %66, %cst_22 {dimension_numbers = #tpu.dot_dimension_numbers<[1], [0], [0], [1], [0, 0, 1, 1], [], []>} : vector<8x128xf32>, vector<128x384xf32>, vector<8x384xf32> -> vector<8x384xf32>
    %68 = vector.extract_strided_slice %65 {offsets = [0, 0], sizes = [8, 256], strides = [1, 1]} : vector<8x384xf32> to vector<8x256xf32>
    %69 = vector.extract_strided_slice %67 {offsets = [0, 0], sizes = [8, 256], strides = [1, 1]} : vector<8x384xf32> to vector<8x256xf32>
    %70 = arith.addf %68, %69 : vector<8x256xf32>
    %71 = arith.negf %70 : vector<8x256xf32>
    %72 = math.exp %71 : vector<8x256xf32>
    %cst_23 = arith.constant 1.000000e+00 : f32
    %73 = vector.broadcast %cst_23 : f32 to vector<8x256xf32>
    %74 = arith.addf %73, %72 : vector<8x256xf32>
    %75 = arith.divf %73, %74 : vector<8x256xf32>
    %76 = vector.extract_strided_slice %75 {offsets = [0, 0], sizes = [8, 128], strides = [1, 1]} : vector<8x256xf32> to vector<8x128xf32>
    %77 = vector.extract_strided_slice %75 {offsets = [0, 128], sizes = [8, 128], strides = [1, 1]} : vector<8x256xf32> to vector<8x128xf32>
    %78 = vector.extract_strided_slice %65 {offsets = [0, 256], sizes = [8, 128], strides = [1, 1]} : vector<8x384xf32> to vector<8x128xf32>
    %79 = vector.extract_strided_slice %67 {offsets = [0, 256], sizes = [8, 128], strides = [1, 1]} : vector<8x384xf32> to vector<8x128xf32>
    %80 = vector.broadcast %3 : vector<1x128xf32> to vector<8x128xf32>
    %81 = arith.addf %79, %80 : vector<8x128xf32>
    %82 = arith.mulf %76, %81 : vector<8x128xf32>
    %83 = arith.addf %78, %82 : vector<8x128xf32>
    %84 = math.tanh %83 : vector<8x128xf32>
    %85 = arith.subf %62, %84 : vector<8x128xf32>
    %86 = arith.mulf %77, %85 : vector<8x128xf32>
    %87 = arith.addf %84, %86 : vector<8x128xf32>
    %c8_i32_24 = arith.constant 8 : i32
    %88 = arith.muli %arg1, %c8_i32_24 : i32
    %89 = arith.addi %88, %c2_i32 : i32
    %c12_i32_25 = arith.constant 12 : i32
    %90 = arith.cmpi slt, %89, %c12_i32_25 : i32
    %91 = arith.select %90, %87, %62 : vector<8x128xf32>
    %c3_i32 = arith.constant 3 : i32
    %92 = arith.index_cast %c3_i32 : i32 to index
    %c0_26 = arith.constant 0 : index
    %c0_27 = arith.constant 0 : index
    %93 = vector.load %arg2[%92, %c0_26, %c0_27] : memref<8x8x384xf32, #tpu.memory_space<vmem>>, vector<1x8x384xf32>
    %94 = vector.shape_cast %93 : vector<1x8x384xf32> to vector<8x384xf32>
    %c0_28 = arith.constant 0 : index
    %c0_29 = arith.constant 0 : index
    %95 = vector.load %arg8[%c0_28, %c0_29] : memref<128x384xf32, #tpu.memory_space<vmem>>, vector<128x384xf32>
    %cst_30 = arith.constant dense<0.000000e+00> : vector<8x384xf32>
    %96 = tpu.matmul %91, %95, %cst_30 {dimension_numbers = #tpu.dot_dimension_numbers<[1], [0], [0], [1], [0, 0, 1, 1], [], []>} : vector<8x128xf32>, vector<128x384xf32>, vector<8x384xf32> -> vector<8x384xf32>
    %97 = vector.extract_strided_slice %94 {offsets = [0, 0], sizes = [8, 256], strides = [1, 1]} : vector<8x384xf32> to vector<8x256xf32>
    %98 = vector.extract_strided_slice %96 {offsets = [0, 0], sizes = [8, 256], strides = [1, 1]} : vector<8x384xf32> to vector<8x256xf32>
    %99 = arith.addf %97, %98 : vector<8x256xf32>
    %100 = arith.negf %99 : vector<8x256xf32>
    %101 = math.exp %100 : vector<8x256xf32>
    %cst_31 = arith.constant 1.000000e+00 : f32
    %102 = vector.broadcast %cst_31 : f32 to vector<8x256xf32>
    %103 = arith.addf %102, %101 : vector<8x256xf32>
    %104 = arith.divf %102, %103 : vector<8x256xf32>
    %105 = vector.extract_strided_slice %104 {offsets = [0, 0], sizes = [8, 128], strides = [1, 1]} : vector<8x256xf32> to vector<8x128xf32>
    %106 = vector.extract_strided_slice %104 {offsets = [0, 128], sizes = [8, 128], strides = [1, 1]} : vector<8x256xf32> to vector<8x128xf32>
    %107 = vector.extract_strided_slice %94 {offsets = [0, 256], sizes = [8, 128], strides = [1, 1]} : vector<8x384xf32> to vector<8x128xf32>
    %108 = vector.extract_strided_slice %96 {offsets = [0, 256], sizes = [8, 128], strides = [1, 1]} : vector<8x384xf32> to vector<8x128xf32>
    %109 = vector.broadcast %3 : vector<1x128xf32> to vector<8x128xf32>
    %110 = arith.addf %108, %109 : vector<8x128xf32>
    %111 = arith.mulf %105, %110 : vector<8x128xf32>
    %112 = arith.addf %107, %111 : vector<8x128xf32>
    %113 = math.tanh %112 : vector<8x128xf32>
    %114 = arith.subf %91, %113 : vector<8x128xf32>
    %115 = arith.mulf %106, %114 : vector<8x128xf32>
    %116 = arith.addf %113, %115 : vector<8x128xf32>
    %c8_i32_32 = arith.constant 8 : i32
    %117 = arith.muli %arg1, %c8_i32_32 : i32
    %118 = arith.addi %117, %c3_i32 : i32
    %c12_i32_33 = arith.constant 12 : i32
    %119 = arith.cmpi slt, %118, %c12_i32_33 : i32
    %120 = arith.select %119, %116, %91 : vector<8x128xf32>
    %c4_i32 = arith.constant 4 : i32
    %121 = arith.index_cast %c4_i32 : i32 to index
    %c0_34 = arith.constant 0 : index
    %c0_35 = arith.constant 0 : index
    %122 = vector.load %arg2[%121, %c0_34, %c0_35] : memref<8x8x384xf32, #tpu.memory_space<vmem>>, vector<1x8x384xf32>
    %123 = vector.shape_cast %122 : vector<1x8x384xf32> to vector<8x384xf32>
    %c0_36 = arith.constant 0 : index
    %c0_37 = arith.constant 0 : index
    %124 = vector.load %arg8[%c0_36, %c0_37] : memref<128x384xf32, #tpu.memory_space<vmem>>, vector<128x384xf32>
    %cst_38 = arith.constant dense<0.000000e+00> : vector<8x384xf32>
    %125 = tpu.matmul %120, %124, %cst_38 {dimension_numbers = #tpu.dot_dimension_numbers<[1], [0], [0], [1], [0, 0, 1, 1], [], []>} : vector<8x128xf32>, vector<128x384xf32>, vector<8x384xf32> -> vector<8x384xf32>
    %126 = vector.extract_strided_slice %123 {offsets = [0, 0], sizes = [8, 256], strides = [1, 1]} : vector<8x384xf32> to vector<8x256xf32>
    %127 = vector.extract_strided_slice %125 {offsets = [0, 0], sizes = [8, 256], strides = [1, 1]} : vector<8x384xf32> to vector<8x256xf32>
    %128 = arith.addf %126, %127 : vector<8x256xf32>
    %129 = arith.negf %128 : vector<8x256xf32>
    %130 = math.exp %129 : vector<8x256xf32>
    %cst_39 = arith.constant 1.000000e+00 : f32
    %131 = vector.broadcast %cst_39 : f32 to vector<8x256xf32>
    %132 = arith.addf %131, %130 : vector<8x256xf32>
    %133 = arith.divf %131, %132 : vector<8x256xf32>
    %134 = vector.extract_strided_slice %133 {offsets = [0, 0], sizes = [8, 128], strides = [1, 1]} : vector<8x256xf32> to vector<8x128xf32>
    %135 = vector.extract_strided_slice %133 {offsets = [0, 128], sizes = [8, 128], strides = [1, 1]} : vector<8x256xf32> to vector<8x128xf32>
    %136 = vector.extract_strided_slice %123 {offsets = [0, 256], sizes = [8, 128], strides = [1, 1]} : vector<8x384xf32> to vector<8x128xf32>
    %137 = vector.extract_strided_slice %125 {offsets = [0, 256], sizes = [8, 128], strides = [1, 1]} : vector<8x384xf32> to vector<8x128xf32>
    %138 = vector.broadcast %3 : vector<1x128xf32> to vector<8x128xf32>
    %139 = arith.addf %137, %138 : vector<8x128xf32>
    %140 = arith.mulf %134, %139 : vector<8x128xf32>
    %141 = arith.addf %136, %140 : vector<8x128xf32>
    %142 = math.tanh %141 : vector<8x128xf32>
    %143 = arith.subf %120, %142 : vector<8x128xf32>
    %144 = arith.mulf %135, %143 : vector<8x128xf32>
    %145 = arith.addf %142, %144 : vector<8x128xf32>
    %c8_i32_40 = arith.constant 8 : i32
    %146 = arith.muli %arg1, %c8_i32_40 : i32
    %147 = arith.addi %146, %c4_i32 : i32
    %c12_i32_41 = arith.constant 12 : i32
    %148 = arith.cmpi slt, %147, %c12_i32_41 : i32
    %149 = arith.select %148, %145, %120 : vector<8x128xf32>
    %c5_i32 = arith.constant 5 : i32
    %150 = arith.index_cast %c5_i32 : i32 to index
    %c0_42 = arith.constant 0 : index
    %c0_43 = arith.constant 0 : index
    %151 = vector.load %arg2[%150, %c0_42, %c0_43] : memref<8x8x384xf32, #tpu.memory_space<vmem>>, vector<1x8x384xf32>
    %152 = vector.shape_cast %151 : vector<1x8x384xf32> to vector<8x384xf32>
    %c0_44 = arith.constant 0 : index
    %c0_45 = arith.constant 0 : index
    %153 = vector.load %arg8[%c0_44, %c0_45] : memref<128x384xf32, #tpu.memory_space<vmem>>, vector<128x384xf32>
    %cst_46 = arith.constant dense<0.000000e+00> : vector<8x384xf32>
    %154 = tpu.matmul %149, %153, %cst_46 {dimension_numbers = #tpu.dot_dimension_numbers<[1], [0], [0], [1], [0, 0, 1, 1], [], []>} : vector<8x128xf32>, vector<128x384xf32>, vector<8x384xf32> -> vector<8x384xf32>
    %155 = vector.extract_strided_slice %152 {offsets = [0, 0], sizes = [8, 256], strides = [1, 1]} : vector<8x384xf32> to vector<8x256xf32>
    %156 = vector.extract_strided_slice %154 {offsets = [0, 0], sizes = [8, 256], strides = [1, 1]} : vector<8x384xf32> to vector<8x256xf32>
    %157 = arith.addf %155, %156 : vector<8x256xf32>
    %158 = arith.negf %157 : vector<8x256xf32>
    %159 = math.exp %158 : vector<8x256xf32>
    %cst_47 = arith.constant 1.000000e+00 : f32
    %160 = vector.broadcast %cst_47 : f32 to vector<8x256xf32>
    %161 = arith.addf %160, %159 : vector<8x256xf32>
    %162 = arith.divf %160, %161 : vector<8x256xf32>
    %163 = vector.extract_strided_slice %162 {offsets = [0, 0], sizes = [8, 128], strides = [1, 1]} : vector<8x256xf32> to vector<8x128xf32>
    %164 = vector.extract_strided_slice %162 {offsets = [0, 128], sizes = [8, 128], strides = [1, 1]} : vector<8x256xf32> to vector<8x128xf32>
    %165 = vector.extract_strided_slice %152 {offsets = [0, 256], sizes = [8, 128], strides = [1, 1]} : vector<8x384xf32> to vector<8x128xf32>
    %166 = vector.extract_strided_slice %154 {offsets = [0, 256], sizes = [8, 128], strides = [1, 1]} : vector<8x384xf32> to vector<8x128xf32>
    %167 = vector.broadcast %3 : vector<1x128xf32> to vector<8x128xf32>
    %168 = arith.addf %166, %167 : vector<8x128xf32>
    %169 = arith.mulf %163, %168 : vector<8x128xf32>
    %170 = arith.addf %165, %169 : vector<8x128xf32>
    %171 = math.tanh %170 : vector<8x128xf32>
    %172 = arith.subf %149, %171 : vector<8x128xf32>
    %173 = arith.mulf %164, %172 : vector<8x128xf32>
    %174 = arith.addf %171, %173 : vector<8x128xf32>
    %c8_i32_48 = arith.constant 8 : i32
    %175 = arith.muli %arg1, %c8_i32_48 : i32
    %176 = arith.addi %175, %c5_i32 : i32
    %c12_i32_49 = arith.constant 12 : i32
    %177 = arith.cmpi slt, %176, %c12_i32_49 : i32
    %178 = arith.select %177, %174, %149 : vector<8x128xf32>
    %c6_i32 = arith.constant 6 : i32
    %179 = arith.index_cast %c6_i32 : i32 to index
    %c0_50 = arith.constant 0 : index
    %c0_51 = arith.constant 0 : index
    %180 = vector.load %arg2[%179, %c0_50, %c0_51] : memref<8x8x384xf32, #tpu.memory_space<vmem>>, vector<1x8x384xf32>
    %181 = vector.shape_cast %180 : vector<1x8x384xf32> to vector<8x384xf32>
    %c0_52 = arith.constant 0 : index
    %c0_53 = arith.constant 0 : index
    %182 = vector.load %arg8[%c0_52, %c0_53] : memref<128x384xf32, #tpu.memory_space<vmem>>, vector<128x384xf32>
    %cst_54 = arith.constant dense<0.000000e+00> : vector<8x384xf32>
    %183 = tpu.matmul %178, %182, %cst_54 {dimension_numbers = #tpu.dot_dimension_numbers<[1], [0], [0], [1], [0, 0, 1, 1], [], []>} : vector<8x128xf32>, vector<128x384xf32>, vector<8x384xf32> -> vector<8x384xf32>
    %184 = vector.extract_strided_slice %181 {offsets = [0, 0], sizes = [8, 256], strides = [1, 1]} : vector<8x384xf32> to vector<8x256xf32>
    %185 = vector.extract_strided_slice %183 {offsets = [0, 0], sizes = [8, 256], strides = [1, 1]} : vector<8x384xf32> to vector<8x256xf32>
    %186 = arith.addf %184, %185 : vector<8x256xf32>
    %187 = arith.negf %186 : vector<8x256xf32>
    %188 = math.exp %187 : vector<8x256xf32>
    %cst_55 = arith.constant 1.000000e+00 : f32
    %189 = vector.broadcast %cst_55 : f32 to vector<8x256xf32>
    %190 = arith.addf %189, %188 : vector<8x256xf32>
    %191 = arith.divf %189, %190 : vector<8x256xf32>
    %192 = vector.extract_strided_slice %191 {offsets = [0, 0], sizes = [8, 128], strides = [1, 1]} : vector<8x256xf32> to vector<8x128xf32>
    %193 = vector.extract_strided_slice %191 {offsets = [0, 128], sizes = [8, 128], strides = [1, 1]} : vector<8x256xf32> to vector<8x128xf32>
    %194 = vector.extract_strided_slice %181 {offsets = [0, 256], sizes = [8, 128], strides = [1, 1]} : vector<8x384xf32> to vector<8x128xf32>
    %195 = vector.extract_strided_slice %183 {offsets = [0, 256], sizes = [8, 128], strides = [1, 1]} : vector<8x384xf32> to vector<8x128xf32>
    %196 = vector.broadcast %3 : vector<1x128xf32> to vector<8x128xf32>
    %197 = arith.addf %195, %196 : vector<8x128xf32>
    %198 = arith.mulf %192, %197 : vector<8x128xf32>
    %199 = arith.addf %194, %198 : vector<8x128xf32>
    %200 = math.tanh %199 : vector<8x128xf32>
    %201 = arith.subf %178, %200 : vector<8x128xf32>
    %202 = arith.mulf %193, %201 : vector<8x128xf32>
    %203 = arith.addf %200, %202 : vector<8x128xf32>
    %c8_i32_56 = arith.constant 8 : i32
    %204 = arith.muli %arg1, %c8_i32_56 : i32
    %205 = arith.addi %204, %c6_i32 : i32
    %c12_i32_57 = arith.constant 12 : i32
    %206 = arith.cmpi slt, %205, %c12_i32_57 : i32
    %207 = arith.select %206, %203, %178 : vector<8x128xf32>
    %c7_i32 = arith.constant 7 : i32
    %208 = arith.index_cast %c7_i32 : i32 to index
    %c0_58 = arith.constant 0 : index
    %c0_59 = arith.constant 0 : index
    %209 = vector.load %arg2[%208, %c0_58, %c0_59] : memref<8x8x384xf32, #tpu.memory_space<vmem>>, vector<1x8x384xf32>
    %210 = vector.shape_cast %209 : vector<1x8x384xf32> to vector<8x384xf32>
    %c0_60 = arith.constant 0 : index
    %c0_61 = arith.constant 0 : index
    %211 = vector.load %arg8[%c0_60, %c0_61] : memref<128x384xf32, #tpu.memory_space<vmem>>, vector<128x384xf32>
    %cst_62 = arith.constant dense<0.000000e+00> : vector<8x384xf32>
    %212 = tpu.matmul %207, %211, %cst_62 {dimension_numbers = #tpu.dot_dimension_numbers<[1], [0], [0], [1], [0, 0, 1, 1], [], []>} : vector<8x128xf32>, vector<128x384xf32>, vector<8x384xf32> -> vector<8x384xf32>
    %213 = vector.extract_strided_slice %210 {offsets = [0, 0], sizes = [8, 256], strides = [1, 1]} : vector<8x384xf32> to vector<8x256xf32>
    %214 = vector.extract_strided_slice %212 {offsets = [0, 0], sizes = [8, 256], strides = [1, 1]} : vector<8x384xf32> to vector<8x256xf32>
    %215 = arith.addf %213, %214 : vector<8x256xf32>
    %216 = arith.negf %215 : vector<8x256xf32>
    %217 = math.exp %216 : vector<8x256xf32>
    %cst_63 = arith.constant 1.000000e+00 : f32
    %218 = vector.broadcast %cst_63 : f32 to vector<8x256xf32>
    %219 = arith.addf %218, %217 : vector<8x256xf32>
    %220 = arith.divf %218, %219 : vector<8x256xf32>
    %221 = vector.extract_strided_slice %220 {offsets = [0, 0], sizes = [8, 128], strides = [1, 1]} : vector<8x256xf32> to vector<8x128xf32>
    %222 = vector.extract_strided_slice %220 {offsets = [0, 128], sizes = [8, 128], strides = [1, 1]} : vector<8x256xf32> to vector<8x128xf32>
    %223 = vector.extract_strided_slice %210 {offsets = [0, 256], sizes = [8, 128], strides = [1, 1]} : vector<8x384xf32> to vector<8x128xf32>
    %224 = vector.extract_strided_slice %212 {offsets = [0, 256], sizes = [8, 128], strides = [1, 1]} : vector<8x384xf32> to vector<8x128xf32>
    %225 = vector.broadcast %3 : vector<1x128xf32> to vector<8x128xf32>
    %226 = arith.addf %224, %225 : vector<8x128xf32>
    %227 = arith.mulf %221, %226 : vector<8x128xf32>
    %228 = arith.addf %223, %227 : vector<8x128xf32>
    %229 = math.tanh %228 : vector<8x128xf32>
    %230 = arith.subf %207, %229 : vector<8x128xf32>
    %231 = arith.mulf %222, %230 : vector<8x128xf32>
    %232 = arith.addf %229, %231 : vector<8x128xf32>
    %c8_i32_64 = arith.constant 8 : i32
    %233 = arith.muli %arg1, %c8_i32_64 : i32
    %234 = arith.addi %233, %c7_i32 : i32
    %c12_i32_65 = arith.constant 12 : i32
    %235 = arith.cmpi slt, %234, %c12_i32_65 : i32
    %236 = arith.select %235, %232, %207 : vector<8x128xf32>
    %c8_i32_66 = arith.constant 8 : i32
    %c0_67 = arith.constant 0 : index
    %c0_68 = arith.constant 0 : index
    %237 = vector.load %arg7[%c0_67, %c0_68] : memref<8x128xf32, #tpu.memory_space<vmem>>, vector<8x128xf32>
    tpu.vector_store %arg7[%c0_67, %c0_68], %236 {strides = array<i32>} : memref<8x128xf32, #tpu.memory_space<vmem>>, vector<8x128xf32>,
    %c1_i32_69 = arith.constant 1 : i32
    %238 = arith.cmpi eq, %arg1, %c1_i32_69 : i32
    %239 = arith.extui %238 : i1 to i32
    %c0_i32_70 = arith.constant 0 : i32
    %240 = arith.cmpi ne, %239, %c0_i32_70 : i32
    scf.if %240 {
      "tpu.region"() ({
        %256 = tpu.sem_alloc : memref<!tpu.dma_semaphore, #tpu.memory_space<semaphore_mem>>
        tpu.enqueue_dma source(%arg5 : memref<128x128xf32, #tpu.memory_space<any>>) target(%arg10 : memref<128x128xf32, #tpu.memory_space<vmem>>) target_semaphore(%256 : memref<!tpu.dma_semaphore, #tpu.memory_space<semaphore_mem>>)
        tpu.wait_dma2 semaphore(%256 : memref<!tpu.dma_semaphore, #tpu.memory_space<semaphore_mem>>) src(%arg5 : memref<128x128xf32, #tpu.memory_space<any>>) dst(%arg10 : memref<128x128xf32, #tpu.memory_space<vmem>>)
        tpu.yield
      }) : () -> ()
      %c1 = arith.constant 1 : index
      %c0_71 = arith.constant 0 : index
      %241 = vector.load %arg9[%c1, %c0_71] : memref<8x128xf32, #tpu.memory_space<vmem>>, vector<1x128xf32>
      %c2 = arith.constant 2 : index
      %c0_72 = arith.constant 0 : index
      %242 = vector.load %arg9[%c2, %c0_72] : memref<8x128xf32, #tpu.memory_space<vmem>>, vector<1x128xf32>
      %c3 = arith.constant 3 : index
      %c0_73 = arith.constant 0 : index
      %243 = vector.load %arg9[%c3, %c0_73] : memref<8x128xf32, #tpu.memory_space<vmem>>, vector<1x128xf32>
      %c0_74 = arith.constant 0 : index
      %c0_75 = arith.constant 0 : index
      %244 = vector.load %arg7[%c0_74, %c0_75] : memref<8x128xf32, #tpu.memory_space<vmem>>, vector<8x128xf32>
      %245 = vector.broadcast %241 : vector<1x128xf32> to vector<8x128xf32>
      %246 = arith.mulf %244, %245 : vector<8x128xf32>
      %247 = vector.broadcast %242 : vector<1x128xf32> to vector<8x128xf32>
      %248 = arith.addf %246, %247 : vector<8x128xf32>
      %cst_76 = arith.constant 0.000000e+00 : f32
      %249 = vector.broadcast %cst_76 : f32 to vector<8x128xf32>
      %250 = arith.maximumf %248, %249 : vector<8x128xf32>
      %c0_77 = arith.constant 0 : index
      %c0_78 = arith.constant 0 : index
      %251 = vector.load %arg10[%c0_77, %c0_78] : memref<128x128xf32, #tpu.memory_space<vmem>>, vector<128x128xf32>
      %cst_79 = arith.constant dense<0.000000e+00> : vector<8x128xf32>
      %252 = tpu.matmul %250, %251, %cst_79 {dimension_numbers = #tpu.dot_dimension_numbers<[1], [0], [0], [1], [0, 0, 1, 1], [], []>} : vector<8x128xf32>, vector<128x128xf32>, vector<8x128xf32> -> vector<8x128xf32>
      %253 = vector.broadcast %243 : vector<1x128xf32> to vector<8x128xf32>
      %254 = arith.addf %252, %253 : vector<8x128xf32>
      %c0_80 = arith.constant 0 : index
      %c0_81 = arith.constant 0 : index
      %255 = vector.load %arg6[%c0_80, %c0_81] : memref<8x128xf32, #tpu.memory_space<vmem>>, vector<8x128xf32>
      tpu.vector_store %arg6[%c0_80, %c0_81], %254 {strides = array<i32>} : memref<8x128xf32, #tpu.memory_space<vmem>>, vector<8x128xf32>,
    } else {
    }
    return
  }
  func.func @transform_0(%arg0: i32, %arg1: i32) -> (i32, i32, i32) {
    %c0_i32 = arith.constant 0 : i32
    %c0_i32_0 = arith.constant 0 : i32
    return %arg1, %arg0, %c0_i32 : i32, i32, i32
  }
  func.func @transform_4(%arg0: i32, %arg1: i32) -> (i32, i32) {
    %c0_i32 = arith.constant 0 : i32
    %c0_i32_0 = arith.constant 0 : i32
    return %arg0, %c0_i32 : i32, i32
  }
}

</mosaic_0001>

<bundles_post_ra>
// kernel: tpu_custom_call.1
= control target key start
LH: loop header
LB: loop body
LE: loop exit
PB: predicated region body
PF: predicated region fallthrough
CT: control target
= control target key end

     0   :  { %9 = vsyncpa [#allocation7], 0  ;;  %s3783_s0 = inlined_call_operand.hbm [shape: f32[16,8,384], index: 0, kind: input, shape index: {}]   ;;  %s3784_s1 = inlined_call_operand.hbm [shape: f32[128,384], index: 1, kind: input, shape index: {}]   ;;  %s3785_s2 = inlined_call_operand.hbm [shape: f32[8,128], index: 2, kind: input, shape index: {}]   ;;  %s3786_s3 = inlined_call_operand.hbm [shape: f32[128,128], index: 3, kind: input, shape index: {}]   ;;  %s3787_s4 = inlined_call_operand.hbm [shape: f32[8,128], index: 4, kind: output, shape index: {}]  }
   0x1   :  { %11 = vsyncpa [#allocation7 + $0x1], 0 }
   0x2   :  { %12 = vsyncpa [#allocation8], 0  ;;  %s3185_s15 = smov 0   ;;  %s3187_s16 = smov 0  }
   0x3   :  { %s3189_s17 = smov 0   ;;  %s3191_s18 = smov 0  }
   0x4   :  { %s3193_s19 = smov 0   ;;  %s3195_s20 = smov 0  }
   0x5 LB: > { %s1810_s21 = sadd.s32 4294967295, %s3144_s20   ;;  %s27_s22 = sadd.s32 1, %s3140_s19  ;;  %s3144_s20 = sphi %s3195_s20, %s18_s20   ;;  %s3140_s19 = sphi %s3193_s19, %s3795_s19   ;;  %s3136_s18 = sphi %s3191_s18, %s3794_s18   ;;  %s3132_s17 = sphi %s3189_s17, %s3793_s17   ;;  %s3128_s16 = sphi %s3187_s16, %s3792_s16   ;;  %s3124_s15 = sphi %s3185_s15, %s3791_s15  }
   0x6   : > { %p28_p0 = scmp.ge.s32.totalorder %s27_s22, 2  ;;  %s39_s23 = sadd.s32 1, %s3132_s17 }
   0x7   : > { %p46_p1 = scmp.ne.s32.totalorder %s3132_s17, %s3128_s16  ;;  %p47_p2 = scmp.eq.s32.totalorder %s3144_s20, 0 }
   0x8   : > { %s3797_s22 = smov (%p28_p0, %s27_s22), 0  ;;  %p52_p4 = scmp.ne.s32.totalorder %s3128_s16, %s3124_s15 }
   0x9   : > { %p48_p3 = por %p47_p2, %p46_p1  ;;  %s34_s24 = ssub.s32 %s3140_s19, %s3797_s22 }
   0xa   : > { %p53_p5 = scmp.eq.s32.totalorder %s1810_s21, 0  ;;  %p37_p6 = scmp.eq.s32.totalorder %s34_s24, 0 }
   0xb   : > { %p2818_p8 = scmp.lt.s32.totalorder %s3144_s20, 2  ;;  %s102_s27 = sand.u32 1, %s3132_s17  }
   0xc   : > { %p3226_p7 = por %p53_p5, %p52_p4  ;;  %s2806_s28 = smul.u32 3072, %s3140_s19 }
   0xd   : > { %s3232_s26 = scalar_select %p37_p6, %s3132_s17, %s39_s23  }
   0xe   : > { %s2805_s29 = smul.u32 192, %s102_s27  ;;  %s3239_s6 = scalar_lea.hbm %s3783_s0, %s2806_s28 }
   0xf   : > { %p3241_p9 = pnand %p2818_p8, %p48_p3  ;;  %s3247_s10 = scalar_lea.sflag [#allocation7], %s102_s27 }
  0x10   : > { %s106_s8 = scalar_lea.vmem [#allocation6], %s2805_s29  ;;  %s2962_s11 = scalar_lea.hbm %s3239_s6, 3072 }
  0x11   : > { %s116_s9 = sshll.u32 %s106_s8, 4  ;;  %p2963_p10 = scmp.ne.s32.totalorder %s3239_s6, %s2962_s11  ;;  %s3245_s9 = int_to_ptr.vmem [resolvable:$true] %s116_s9 }
  0x12   : > { %p2964_p11 = pneg %p3241_p9  ;;  %s2967_s14 = scalar_lea.hbm %s3783_s0, 6144 }
  0x13   : > { %p2968_p0 = scmp.lt.u32.totalorder %s3239_s6, %s3783_s0  ;;  %p2969_p1 = scmp.lt.u32.totalorder %s2967_s14, %s2962_s11 }
  0x14   : > { %p2965_p12 = pnand %p2964_p11, %p2963_p10  ;;  %p2971_p3 = scmp.lt.u32.totalorder %s2962_s11, %s3239_s6 }
  0x15   : > { %p2970_p2 = por %p2969_p1, %p2968_p0 }
  0x16   : > { %p2966_p13 = pneg %p2965_p12 }
  0x17   : > { %p2972_p4 = por %p2971_p3, %p2970_p2 }
  0x19   : > { %p2973_p5 = pnand %p2972_p4, %p2966_p13 }
  0x1b   : > { %2976 = shalt.err (!%p2973_p5)
}
  0x1c   : > { %s2977_s24 = scalar_lea.vmem %s3245_s9, 3072  ;;  %s3146_s27 = smov [#allocation6]  }
  0x1d   : > { %p2978_p6 = scmp.ne.s32.totalorder %s3245_s9, %s2977_s24  ;;  %s2982_s28 = sshll.u32 %s3146_s27, 4  ;;  %s2983_s28 = int_to_ptr.vmem [resolvable:$false] %s2982_s28 }
  0x1e   : > { %s2984_s29 = scalar_lea.vmem %s2983_s28, 6144  ;;  %p2985_p12 = scmp.lt.s32.totalorder %s3245_s9, %s2983_s28 }
  0x1f   : > { %p2980_p8 = pnand %p2978_p6, %p2964_p11  ;;  %p2986_p0 = scmp.lt.s32.totalorder %s2984_s29, %s2977_s24 }
  0x21   : > { %p2981_p10 = pneg %p2980_p8  ;;  %p2987_p1 = por %p2986_p0, %p2985_p12 }
  0x23   : > { %p2988_p2 = pnand %p2987_p1, %p2981_p10 }
  0x25   : > { %2991 = shalt.err (!%p2988_p2)
}
  0x26   : > { %s3147_s30 = smov 384   ;;  %s3148_s5 = smov 24  }
  0x27   : > { %2817 = dma.hbm_to_vmem [thread:$0]  (!%p3241_p9), %s3239_s6, 3072, %s3245_s9, %s3247_s10, %s3147_s30, %s3147_s30, %s3148_s5  }
  0x28   : > { %p1816_p11 = scmp.ge.s32.totalorder %s3144_s20, 1  ;;  %p124_p13 = scmp.lt.s32.totalorder %s3144_s20, 3 }
  0x2a   : > { %p125_p3 = pnand %p1816_p11, %p124_p13 }
  0x2b   : > { %s130_s8 = sand.u32 (!%p125_p3), 1, %s3128_s16  }
  0x2c   : > { %128 = sbr.rel (%p125_p3) target bundleno = 2520 (0x9d8), region = 24  ;;  %s131_s12 = scalar_lea.sflag (!%p125_p3), [#allocation7], %s130_s8 }
  0x2d   : > { %s2807_s11 = smul.u32 (!%p125_p3), 192, %s130_s8 }
  0x2f   : > { %s3278_s13 = scalar_lea.vmem (!%p125_p3), [#allocation6], %s2807_s11 }
  0x33   : > { %3109 = dma.done.wait (%p3226_p7), %s131_s12, 3072  }
  0x34   : > { %3111 = vsyncadd (%p3226_p7), %s131_s12, 4294964224  ;;  %p1817_p4 = scmp.ne.s32.totalorder %s3136_s18, 0 }
  0x35   : > { %v3149_v0 = vmov (!%p1817_p4), 0.0  }
  0x36   : > { %152 = sbr.rel (%p1817_p4) target bundleno = 97 (0x61), region = 32  ;;  %153 = vst [vmem:[#allocation2] sm:$0xff] (!%p1817_p4), %v3149_v0 }
  0x3d   : > { %s3150_s6 = smov [#allocation3]   ;;  %s2992_s14 = scalar_lea.hbm %s3784_s1, 6144 }
  0x3e   : > { %s161_s7 = sshll.u32 %s3150_s6, 4  ;;  %p2993_p9 = scmp.ne.s32.totalorder %s3784_s1, %s2992_s14  ;;  %s162_s7 = int_to_ptr.vmem [resolvable:$true] %s161_s7 }
  0x3f   : > { %p2996_p7 = scmp.lt.u32.totalorder %s2992_s14, %s3784_s1 }
  0x41   : > { %p2998_p5 = pnand %p2996_p7, %p2993_p9 }
  0x43   : > { %3001 = shalt.err (!%p2998_p5)  }
  0x44   : > { %s3002_s25 = scalar_lea.vmem %s162_s7, 6144  ;;  %p3007_p8 = scmp.lt.s32.totalorder %s162_s7, %s162_s7 }
  0x45   : > { %p3003_p6 = scmp.ne.s32.totalorder %s162_s7, %s3002_s25  ;;  %p3008_p10 = scmp.lt.s32.totalorder %s3002_s25, %s3002_s25 }
  0x47   : > { %p3009_p12 = por %p3008_p10, %p3007_p8 }
  0x49   : > { %p3010_p0 = pnand %p3009_p12, %p3003_p6 }
  0x4b   : > { %3013 = shalt.err (!%p3010_p0)  }
  0x4c   : > { %164 = dma.hbm_to_vmem [thread:$0]  %s3784_s1, 6144, %s162_s7, [#allocation10] }
  0x4d   : > { %3112 = dma.done.wait [#allocation10], 6144 }
  0x4e   : > { %3113 = vsyncadd [#allocation10], 4294961152 }
  0x4f   : > { %s3151_s30 = smov [#allocation4]   ;;  %s3014_s12 = scalar_lea.hbm %s3785_s2, 128 }
  0x50   : > { %s176_s5 = sshll.u32 %s3151_s30, 4  ;;  %p3015_p1 = scmp.ne.s32.totalorder %s3785_s2, %s3014_s12  ;;  %s177_s5 = int_to_ptr.vmem [resolvable:$true] %s176_s5 }
  0x51   : > { %p3018_p2 = scmp.lt.u32.totalorder %s3014_s12, %s3785_s2 }
  0x53   : > { %p3020_p11 = pnand %p3018_p2, %p3015_p1 }
  0x55   : > { %3023 = shalt.err (!%p3020_p11)  }
  0x56   : > { %s3024_s7 = scalar_lea.vmem %s177_s5, 128  ;;  %p3029_p3 = scmp.lt.s32.totalorder %s177_s5, %s177_s5 }
  0x57   : > { %p3025_p13 = scmp.ne.s32.totalorder %s177_s5, %s3024_s7  ;;  %p3030_p4 = scmp.lt.s32.totalorder %s3024_s7, %s3024_s7 }
  0x59   : > { %p3031_p9 = por %p3030_p4, %p3029_p3 }
  0x5b   : > { %p3032_p7 = pnand %p3031_p9, %p3025_p13 }
  0x5d   : > { %3035 = shalt.err (!%p3032_p7)  }
  0x5e   : > { %179 = dma.hbm_to_vmem [thread:$0]  %s3785_s2, 128, %s177_s5, [#allocation15] }
  0x5f   : > { %3114 = dma.done.wait [#allocation15], 128 }
  0x60   : > { %3115 = vsyncadd [#allocation15], 4294967168 }
  0x61 PF: > { %v189_v1 = vld [vmem:[#allocation3 + $0x8] sm:$0xff]  ;;  %v192_v2 = vld [vmem:[#allocation3 + $0x20] sm:$0xff]  ;;  %v191_v5 = vld [vmem:[#allocation3 + $0x18] sm:$0xff]  ;;  %v3152_v8 = vmov 0.0|0.0   ;;  %v3153_v9 = vmov 0.0   ;;  %vm3154_vm0 = vmmov 0  }
  0x62   : > { %v188_v3 = vld [vmem:[#allocation3] sm:$0xff]  ;;  %v3309_v4 = vpack.c.bf16 %v192_v2, %v189_v1  ;;  %v195_v6 = vld [vmem:[#allocation3 + $0x38] sm:$0xff]  ;;  %v198_v7 = vld [vmem:[#allocation3 + $0x50] sm:$0xff]  ;;  %2365 = vmatprep.subr.bf16.mxu1 %v3152_v8  ;;  %300 = vmatprep.mubr.f32.mxu0 %v3153_v9  ;;  %s3440_s24 = sshll.u32 %s3136_s18, 3  ;;  %p1857_p11 = scmp.ne.s32.totalorder %s3136_s18, 1 }
  0x63   : > { %v3313_v10 = vpack.c.bf16 %v191_v5, %v188_v3  ;;  %v3315_v11 = vpack.c.bf16 %v198_v7, %v195_v6  ;;  %v194_v12 = vld [vmem:[#allocation3 + $0x30] sm:$0xff]  ;;  %v197_v13 = vld [vmem:[#allocation3 + $0x48] sm:$0xff]  ;;  %2050 = vmatprep.mubr.msk.f32.mxu1 %vm3154_vm0, %v3153_v9  ;;  %v204_v15 = vld [vmem:[#allocation3 + $0x80] sm:$0xff]  ;;  %p403_p5 = scmp.lt.s32.totalorder %s3440_s24, 12  ;;  %s574_s25 = sadd.s32 1, %s3440_s24 }
  0x64   : > { %v201_v14 = vld [vmem:[#allocation3 + $0x68] sm:$0xff]  ;;  %2334 = vmatprep.subr.bf16.mxu0 %v3309_v4  ;;  %v3321_v16 = vpack.c.bf16 %v197_v13, %v194_v12  ;;  %v200_v18 = vld [vmem:[#allocation3 + $0x60] sm:$0xff]  ;;  %v203_v19 = vld [vmem:[#allocation3 + $0x78] sm:$0xff]  ;;  %p575_p6 = scmp.lt.s32.totalorder %s574_s25, 12  ;;  %s746_s29 = sadd.s32 2, %s3440_s24 }
  0x65   : > { %2336 = vmatpush1.bf16.msra.mxu0 %v3313_v10  ;;  %v3324_v17 = vpack.c.bf16 %v204_v15, %v201_v14  ;;  %v207_v20 = vld [vmem:[#allocation3 + $0x98] sm:$0xff]  ;;  %v210_v21 = vld [vmem:[#allocation3 + $0xb0] sm:$0xff]  ;;  %v3327_v22 = vpack.c.bf16 %v203_v19, %v200_v18  ;;  %v209_v25 = vld [vmem:[#allocation3 + $0xa8] sm:$0xff]  ;;  %s404_s27 = scalar_select %p403_p5, 1, 0 }
  0x66   : > { %2338 = vmatprep.subr.bf16.mxu0 %v3315_v11  ;;  %v206_v23 = vld [vmem:[#allocation3 + $0x90] sm:$0xff]  ;;  %v3330_v24 = vpack.c.bf16 %v210_v21, %v207_v20  ;;  %v193_v27 = vld [vmem:[#allocation3 + $0x28] sm:$0xff]  ;;  %v216_v29 = vld [vmem:[#allocation3 + $0xe0] sm:$0xff]  ;;  %s576_s28 = scalar_select %p575_p6, 1, 0 }
  0x67   : > { %v190_v26 = vld [vmem:[#allocation3 + $0x10] sm:$0xff]  ;;  %v213_v28 = vld [vmem:[#allocation3 + $0xc8] sm:$0xff]  ;;  %v196_v31 = vld [vmem:[#allocation3 + $0x40] sm:$0xff]  ;;  %v3335_v33 = vpack.c.bf16 %v209_v25, %v206_v23  ;;  %p747_p8 = scmp.lt.s32.totalorder %s746_s29, 12  ;;  %s918_s5 = sadd.s32 3, %s3440_s24 }
  0x68   : > { %v3332_v30 = vpack.c.bf16 %v193_v27, %v190_v26  ;;  %v199_v32 = vld [vmem:[#allocation3 + $0x58] sm:$0xff]  ;;  %v212_v34 = vld [vmem:[#allocation3 + $0xc0] sm:$0xff]  ;;  %v3341_v36 = vpack.c.bf16 %v216_v29, %v213_v28  ;;  %v202_v38 = vld [vmem:[#allocation3 + $0x70] sm:$0xff]  ;;  %p919_p10 = scmp.lt.s32.totalorder %s918_s5, 12  ;;  %s1090_s11 = sadd.s32 4, %s3440_s24 }
  0x69   : > { %2340 = vmatpush1.bf16.msra.mxu0 %v3321_v16  ;;  %v3338_v35 = vpack.c.bf16 %v199_v32, %v196_v31  ;;  %v215_v37 = vld [vmem:[#allocation3 + $0xd8] sm:$0xff]  ;;  %v205_v39 = vld [vmem:[#allocation3 + $0x88] sm:$0xff]  ;;  %v222_v41 = vld [vmem:[#allocation3 + $0x110] sm:$0xff]  ;;  %s748_s30 = scalar_select %p747_p8, 1, 0 }
  0x6a   : > { %2342 = vmatprep.subr.bf16.mxu0 %v3324_v17  ;;  %2367 = vmatpush3.bf16.msra.mxu1 %v3332_v30  ;;  %v219_v40 = vld [vmem:[#allocation3 + $0xf8] sm:$0xff]  ;;  %v3345_v42 = vpack.c.bf16 %v215_v37, %v212_v34  ;;  %v218_v43 = vld [vmem:[#allocation3 + $0xf0] sm:$0xff]  ;;  %v3348_v44 = vpack.c.bf16 %v205_v39, %v202_v38  ;;  %v221_v46 = vld [vmem:[#allocation3 + $0x108] sm:$0xff]  ;;  %s920_s8 = scalar_select %p919_p10, 1, 0 }
  0x6b   : > { %2368 = vmatprep.subr.bf16.mxu1 %v3152_v8  ;;  %v3351_v45 = vpack.c.bf16 %v222_v41, %v219_v40  ;;  %v208_v47 = vld [vmem:[#allocation3 + $0xa0] sm:$0xff]  ;;  %v211_v48 = vld [vmem:[#allocation3 + $0xb8] sm:$0xff]  ;;  %v225_v49 = vld [vmem:[#allocation3 + $0x128] sm:$0xff]  ;;  %v3355_v51 = vpack.c.bf16 %v221_v46, %v218_v43  ;;  %p1091_p12 = scmp.lt.s32.totalorder %s1090_s11, 12  ;;  %s1262_s6 = sadd.s32 5, %s3440_s24 }
  0x6c   : > { %v228_v50 = vld [vmem:[#allocation3 + $0x140] sm:$0xff]  ;;  %v3358_v53 = vpack.c.bf16 %v211_v48, %v208_v47  ;;  %v227_v55 = vld [vmem:[#allocation3 + $0x138] sm:$0xff]  ;;  %v214_v56 = vld [vmem:[#allocation3 + $0xd0] sm:$0xff]  ;;  %p1263_p0 = scmp.lt.s32.totalorder %s1262_s6, 12  ;;  %s1434_s10 = sadd.s32 6, %s3440_s24 }
  0x6d   : > { %2344 = vmatpush1.bf16.msra.mxu0 %v3327_v22  ;;  %v224_v52 = vld [vmem:[#allocation3 + $0x120] sm:$0xff]  ;;  %v3361_v54 = vpack.c.bf16 %v228_v50, %v225_v49  ;;  %v217_v57 = vld [vmem:[#allocation3 + $0xe8] sm:$0xff]  ;;  %v231_v58 = vld [vmem:[#allocation3 + $0x158] sm:$0xff]  ;;  %v405_v50 = vstv %s404_s27  ;;  %s1092_s12 = scalar_select %p1091_p12, 1, 0 }
  0x6e   : > { %2346 = vmatprep.subr.bf16.mxu0 %v3330_v24  ;;  %2370 = vmatpush3.bf16.msra.mxu1 %v3338_v35  ;;  %v234_v59 = vld [vmem:[#allocation3 + $0x170] sm:$0xff]  ;;  %v3365_v60 = vpack.c.bf16 %v227_v55, %v224_v52  ;;  %v3368_v62 = vpack.c.bf16 %v217_v57, %v214_v56  ;;  %v233_v0 = vld [vmem:[#allocation3 + $0x168] sm:$0xff]  ;;  %v220_v1 = vld [vmem:[#allocation3 + $0x100] sm:$0xff]  ;;  %vm406_vm1 = vcmp.eq.s32.totalorder %v405_v50, 1  ;;  %s1264_s9 = scalar_select %p1263_p0, 1, 0 }
  0x6f   : > { %2371 = vmatprep.subr.bf16.mxu1 %v3152_v8  ;;  %v230_v61 = vld [vmem:[#allocation3 + $0x150] sm:$0xff]  ;;  %v3371_v63 = vpack.c.bf16 %v234_v59, %v231_v58  ;;  %v223_v2 = vld [vmem:[#allocation3 + $0x118] sm:$0xff]  ;;  %v229_v7 = vld [vmem:[#allocation3 + $0x148] sm:$0xff]  ;;  %p1435_p1 = scmp.lt.s32.totalorder %s1434_s10, 12  ;;  %s1606_s7 = sadd.s32 7, %s3440_s24 }
  0x70   : > { %v3375_v3 = vpack.c.bf16 %v233_v0, %v230_v61  ;;  %v3378_v5 = vpack.c.bf16 %v223_v2, %v220_v1  ;;  %v226_v6 = vld [vmem:[#allocation3 + $0x130] sm:$0xff]  ;;  %v3383_v12 = vld [vmem:[#allocation2] sm:$0xff]  ;;  %v232_v14 = vld [vmem:[#allocation3 + $0x160] sm:$0xff]  ;;  %p1607_p2 = scmp.lt.s32.totalorder %s1606_s7, 12 }
  0x71   : > { %2348 = vmatpush1.bf16.msra.mxu0 %v3335_v33  ;;  %v3386_v13 = vpack.c.bf16 %v229_v7, %v226_v6  ;;  %v235_v15 = vld [vmem:[#allocation3 + $0x178] sm:$0xff]  ;;  %v185_v19 = vld [vmem:[%s3278_s13] sm:$0xff]  ;;  %v186_v26 = vld [vmem:[%s3278_s13 + $0x8] sm:$0xff]  ;;  %s1436_s14 = scalar_select %p1435_p1, 1, 0 }
  0x72   : > { %2350 = vmatprep.subr.bf16.mxu0 %v3341_v36  ;;  %2373 = vmatpush3.bf16.msra.mxu1 %v3348_v44  ;;  %v3392_v18 = vpack.c.bf16 %v235_v15, %v232_v14  ;;  %v3435_v37 = vld [vmem:[#allocation4] ss:$0 sm:$0xff]  ;;  %v187_v41 = vld [vmem:[%s3278_s13 + $0x10] sm:$0xff]  ;;  %v1823_v7 = vld [vmem:[%s3278_s13 + $0x20] sm:$0xff]  ;;  %s1608_s15 = scalar_select %p1607_p2, 1, 0 }
  0x73   : > { %2374 = vmatprep.subr.bf16.mxu1 %v3152_v8  ;;  %v1822_v58 = vld [vmem:[%s3278_s13 + $0x18] sm:$0xff] }
  0x75   : > { %2352 = vmatpush1.bf16.msra.mxu0 %v3345_v42 }
  0x76   : > { %2354 = vmatprep.subr.bf16.mxu0 %v3351_v45  ;;  %2376 = vmatpush3.bf16.msra.mxu1 %v3358_v53 }
  0x77   : > { %2377 = vmatprep.subr.bf16.mxu1 %v3152_v8 }
  0x79   : > { %2356 = vmatpush1.bf16.msra.mxu0 %v3355_v51 }
  0x7a   : > { %2358 = vmatprep.subr.bf16.mxu0 %v3361_v54  ;;  %2379 = vmatpush3.bf16.msra.mxu1 %v3368_v62 }
  0x7b   : > { %2380 = vmatprep.subr.bf16.mxu1 %v3152_v8 }
  0x7d   : > { %2360 = vmatpush1.bf16.msra.mxu0 %v3365_v60 }
  0x7e   : > { %2362 = vmatprep.subr.bf16.mxu0 %v3371_v63  ;;  %2382 = vmatpush3.bf16.msra.mxu1 %v3378_v5 }
  0x7f   : > { %2383 = vmatprep.subr.bf16.mxu1 %v3152_v8 }
  0x81   : > { %2364 = vmatpush1.bf16.msra.mxu0 %v3375_v3 }
  0x82   : > { %2390 = vmatprep.subr.bf16.mxu0 %v3309_v4  ;;  %2385 = vmatpush3.bf16.msra.mxu1 %v3386_v13 }
  0x83   : > { %2386 = vmatprep.subr.bf16.mxu1 %v3152_v8 }
  0x84   : > { %301 = vmatmul.mubr.f32.vlgmr.msra.gmra.mrb[0].mxu0 %v3383_v12 }
  0x85   : > { %2392 = vmatpush1.bf16.msra.mxu0 %v3313_v10  ;;  %476 = vmatprep.mubr.f32.mxu0 %v3153_v9 }
  0x86   : > { %2394 = vmatprep.subr.bf16.mxu0 %v3315_v11  ;;  %2388 = vmatpush3.bf16.msra.mxu1 %v3392_v18 }
  0x87   : > { %2421 = vmatprep.subr.bf16.mxu1 %v3152_v8 }
  0x89   : > { %2396 = vmatpush1.bf16.msra.mxu0 %v3321_v16  ;;  %2051 = vmatmul.mubr.f32.vlgmr.msra.gmra.mrb[0].mxu1 %v3383_v12 }
  0x8a   : > { %2398 = vmatprep.subr.bf16.mxu0 %v3324_v17  ;;  %2423 = vmatpush3.bf16.msra.mxu1 %v3332_v30 }
  0x8b   : > { %2424 = vmatprep.subr.bf16.mxu1 %v3152_v8  ;;  %2085 = vmatprep.mubr.msk.f32.mxu1 %vm3154_vm0, %v3153_v9 }
  0x8d   : > { %2400 = vmatpush1.bf16.msra.mxu0 %v3327_v22 }
  0x8e   : > { %2402 = vmatprep.subr.bf16.mxu0 %v3330_v24  ;;  %2426 = vmatpush3.bf16.msra.mxu1 %v3338_v35 }
  0x8f   : > { %2427 = vmatprep.subr.bf16.mxu1 %v3152_v8 }
  0x91   : > { %2404 = vmatpush1.bf16.msra.mxu0 %v3335_v33 }
  0x92   : > { %2406 = vmatprep.subr.bf16.mxu0 %v3341_v36  ;;  %2429 = vmatpush3.bf16.msra.mxu1 %v3348_v44 }
  0x93   : > { %2430 = vmatprep.subr.bf16.mxu1 %v3152_v8 }
  0x95   : > { %2408 = vmatpush1.bf16.msra.mxu0 %v3345_v42 }
  0x96   : > { %2410 = vmatprep.subr.bf16.mxu0 %v3351_v45  ;;  %2432 = vmatpush3.bf16.msra.mxu1 %v3358_v53 }
  0x97   : > { %2433 = vmatprep.subr.bf16.mxu1 %v3152_v8 }
  0x99   : > { %2412 = vmatpush1.bf16.msra.mxu0 %v3355_v51 }
  0x9a   : > { %2414 = vmatprep.subr.bf16.mxu0 %v3361_v54  ;;  %2435 = vmatpush3.bf16.msra.mxu1 %v3368_v62 }
  0x9b   : > { %2436 = vmatprep.subr.bf16.mxu1 %v3152_v8 }
  0x9d   : > { %2416 = vmatpush1.bf16.msra.mxu0 %v3365_v60 }
  0x9e   : > { %2418 = vmatprep.subr.bf16.mxu0 %v3371_v63  ;;  %2438 = vmatpush3.bf16.msra.mxu1 %v3378_v5 }
  0x9f   : > { %2439 = vmatprep.subr.bf16.mxu1 %v3152_v8 }
  0xa1   : > { %2420 = vmatpush1.bf16.msra.mxu0 %v3375_v3 }
  0xa2   : > { %2446 = vmatprep.subr.bf16.mxu0 %v3309_v4  ;;  %2441 = vmatpush3.bf16.msra.mxu1 %v3386_v13 }
  0xa3   : > { %2442 = vmatprep.subr.bf16.mxu1 %v3152_v8 }
  0xa6   : > { %2444 = vmatpush3.bf16.msra.mxu1 %v3392_v18 }
  0xa7   : > { %2477 = vmatprep.subr.bf16.mxu1 %v3152_v8 }
 0x157   : > { %v302_v20 = vpop.f32.mrb[0].mxu0 }
 0x158   : > { %v377_v21 = vadd.f32 %v302_v20, %v185_v19  ;;  %v304_v23 = vpop.f32.mrb[1].mxu0 }
 0x159   : > { %v378_v28 = vadd.f32 %v304_v23, %v186_v26 }
 0x15a   : > { %v1818_v25 = vmul.f32 -1.442695, %v377_v21 }
 0x15b   : > { %v1819_v31 = vmul.f32 -1.442695, %v378_v28 }
 0x15c   : > { %2882 = vpow2.f32 %v1818_v25  ;;  %v373_v27 = vpop.f32.mrb[0].mxu1  ;;  %v1824_v25 = vld [vmem:[%s3278_s13 + $0x28] sm:$0xff] }
 0x15d   : > { %v2052_v29 = vpop.f32.mrb[1].mxu1  ;;  %2884 = vpow2.f32 %v1819_v31  ;;  %v395_v38 = vadd.f32 %v3435_v37, %v373_v27 }
 0x166   : > { %v2883_v32 = vpop.eup %2882 }
 0x167   : > { %v385_v34 = vadd.f32 1.0, %v2883_v32  ;;  %v2885_v39 = vpop.eup %2884  ;;  %v577_v32 = vstv %s576_s28 }
 0x168   : > { %v386_v46 = vadd.f32 1.0, %v2885_v39  ;;  %vm578_vm2 = vcmp.eq.s32.totalorder %v577_v32, 1 }
 0x169   : > { %2886 = vrcp.f32 %v385_v34 }
 0x173   : > { %v2887_v40 = vpop.eup %2886 }
 0x174   : > { %v396_v43 = vmul.f32 %v2887_v40, %v395_v38 }
 0x176   : > { %v397_v47 = vadd.f32 %v396_v43, %v187_v41  ;;  %v1827_v41 = vld [vmem:[%s3278_s13 + $0x30] sm:$0xff] }
 0x178   : > { %2888 = vtanh.f32 %v397_v47 }
 0x179   : > { %2890 = vrcp.f32 %v386_v46 }
 0x182   : > { %v2889_v48 = vpop.eup %2888 }
 0x183   : > { %v399_v49 = vsub.f32 %v3383_v12, %v2889_v48  ;;  %v2891_v52 = vpop.eup %2890 }
 0x185   : > { %v400_v55 = vmul.f32 %v2891_v52, %v399_v49  ;;  %v1828_v52 = vld [vmem:[%s3278_s13 + $0x38] sm:$0xff] }
 0x187   : > { %v401_v56 = vadd.f32 %v2889_v48, %v400_v55 }
 0x189   : > { %v3445_v57 = vsel %vm406_vm1, %v401_v56, %v3383_v12 }
 0x18a   : > { %477 = vmatmul.mubr.f32.vlgmr.msra.gmra.mrb[2].mxu0 %v3445_v57  ;;  %2086 = vmatmul.mubr.f32.vlgmr.msra.gmra.mrb[2].mxu1 %v3445_v57 }
 0x18b   : > { %2448 = vmatpush1.bf16.msra.mxu0 %v3313_v10  ;;  %2479 = vmatpush3.bf16.msra.mxu1 %v3332_v30 }
 0x18c   : > { %2450 = vmatprep.subr.bf16.mxu0 %v3315_v11  ;;  %2480 = vmatprep.subr.bf16.mxu1 %v3152_v8 }
 0x18d   : > { %648 = vmatprep.mubr.f32.mxu0 %v3153_v9  ;;  %2120 = vmatprep.mubr.msk.f32.mxu1 %vm3154_vm0, %v3153_v9 }
 0x18f   : > { %2452 = vmatpush1.bf16.msra.mxu0 %v3321_v16  ;;  %2482 = vmatpush3.bf16.msra.mxu1 %v3338_v35 }
 0x190   : > { %2454 = vmatprep.subr.bf16.mxu0 %v3324_v17  ;;  %2483 = vmatprep.subr.bf16.mxu1 %v3152_v8 }
 0x193   : > { %2456 = vmatpush1.bf16.msra.mxu0 %v3327_v22  ;;  %2485 = vmatpush3.bf16.msra.mxu1 %v3348_v44 }
 0x194   : > { %2458 = vmatprep.subr.bf16.mxu0 %v3330_v24  ;;  %2486 = vmatprep.subr.bf16.mxu1 %v3152_v8 }
 0x197   : > { %2460 = vmatpush1.bf16.msra.mxu0 %v3335_v33  ;;  %2488 = vmatpush3.bf16.msra.mxu1 %v3358_v53 }
 0x198   : > { %2462 = vmatprep.subr.bf16.mxu0 %v3341_v36  ;;  %2489 = vmatprep.subr.bf16.mxu1 %v3152_v8 }
 0x19b   : > { %2464 = vmatpush1.bf16.msra.mxu0 %v3345_v42  ;;  %2491 = vmatpush3.bf16.msra.mxu1 %v3368_v62 }
 0x19c   : > { %2466 = vmatprep.subr.bf16.mxu0 %v3351_v45  ;;  %2492 = vmatprep.subr.bf16.mxu1 %v3152_v8 }
 0x19f   : > { %2468 = vmatpush1.bf16.msra.mxu0 %v3355_v51  ;;  %2494 = vmatpush3.bf16.msra.mxu1 %v3378_v5 }
 0x1a0   : > { %2470 = vmatprep.subr.bf16.mxu0 %v3361_v54  ;;  %2495 = vmatprep.subr.bf16.mxu1 %v3152_v8 }
 0x1a3   : > { %2472 = vmatpush1.bf16.msra.mxu0 %v3365_v60  ;;  %2497 = vmatpush3.bf16.msra.mxu1 %v3386_v13 }
 0x1a4   : > { %2474 = vmatprep.subr.bf16.mxu0 %v3371_v63  ;;  %2498 = vmatprep.subr.bf16.mxu1 %v3152_v8 }
 0x1a7   : > { %2476 = vmatpush1.bf16.msra.mxu0 %v3375_v3  ;;  %2500 = vmatpush3.bf16.msra.mxu1 %v3392_v18 }
 0x1a8   : > { %2502 = vmatprep.subr.bf16.mxu0 %v3309_v4  ;;  %2533 = vmatprep.subr.bf16.mxu1 %v3152_v8 }
 0x25d   : > { %v478_v59 = vpop.f32.mrb[2].mxu0  ;;  %v549_v61 = vpop.f32.mrb[2].mxu1 }
 0x25e   : > { %v553_v0 = vadd.f32 %v1822_v58, %v478_v59  ;;  %v480_v1 = vpop.f32.mrb[3].mxu0  ;;  %v2087_v2 = vpop.f32.mrb[3].mxu1  ;;  %v567_v21 = vadd.f32 %v3435_v37, %v549_v61 }
 0x25f   : > { %v554_v12 = vadd.f32 %v1823_v7, %v480_v1  ;;  %v1829_v1 = vld [vmem:[%s3278_s13 + $0x40] sm:$0xff] }
 0x260   : > { %v1825_v6 = vmul.f32 -1.442695, %v553_v0 }
 0x261   : > { %v1826_v14 = vmul.f32 -1.442695, %v554_v12 }
 0x262   : > { %2892 = vpow2.f32 %v1825_v6 }
 0x263   : > { %2894 = vpow2.f32 %v1826_v14 }
 0x26c   : > { %v2893_v15 = vpop.eup %2892 }
 0x26d   : > { %v561_v19 = vadd.f32 1.0, %v2893_v15  ;;  %v2895_v20 = vpop.eup %2894  ;;  %v749_v15 = vstv %s748_s30 }
 0x26e   : > { %v562_v28 = vadd.f32 1.0, %v2895_v20  ;;  %vm750_vm3 = vcmp.eq.s32.totalorder %v749_v15, 1 }
 0x26f   : > { %2896 = vrcp.f32 %v561_v19 }
 0x279   : > { %v2897_v23 = vpop.eup %2896 }
 0x27a   : > { %v568_v26 = vmul.f32 %v2897_v23, %v567_v21 }
 0x27c   : > { %v569_v27 = vadd.f32 %v1824_v25, %v568_v26  ;;  %v1832_v25 = vld [vmem:[%s3278_s13 + $0x48] sm:$0xff] }
 0x27e   : > { %2898 = vtanh.f32 %v569_v27 }
 0x27f   : > { %2900 = vrcp.f32 %v562_v28 }
 0x288   : > { %v2899_v29 = vpop.eup %2898 }
 0x289   : > { %v571_v31 = vsub.f32 %v3445_v57, %v2899_v29  ;;  %v2901_v34 = vpop.eup %2900 }
 0x28b   : > { %v572_v38 = vmul.f32 %v2901_v34, %v571_v31  ;;  %v1833_v34 = vld [vmem:[%s3278_s13 + $0x50] sm:$0xff] }
 0x28d   : > { %v573_v39 = vadd.f32 %v2899_v29, %v572_v38 }
 0x28f   : > { %v3491_v40 = vsel %vm578_vm2, %v573_v39, %v3445_v57 }
 0x290   : > { %649 = vmatmul.mubr.f32.vlgmr.msra.gmra.mrb[4].mxu0 %v3491_v40  ;;  %2121 = vmatmul.mubr.f32.vlgmr.msra.gmra.mrb[4].mxu1 %v3491_v40 }
 0x291   : > { %2504 = vmatpush1.bf16.msra.mxu0 %v3313_v10  ;;  %2535 = vmatpush3.bf16.msra.mxu1 %v3332_v30 }
 0x292   : > { %2506 = vmatprep.subr.bf16.mxu0 %v3315_v11  ;;  %2536 = vmatprep.subr.bf16.mxu1 %v3152_v8 }
 0x293   : > { %820 = vmatprep.mubr.f32.mxu0 %v3153_v9  ;;  %2155 = vmatprep.mubr.msk.f32.mxu1 %vm3154_vm0, %v3153_v9 }
 0x295   : > { %2508 = vmatpush1.bf16.msra.mxu0 %v3321_v16  ;;  %2538 = vmatpush3.bf16.msra.mxu1 %v3338_v35 }
 0x296   : > { %2510 = vmatprep.subr.bf16.mxu0 %v3324_v17  ;;  %2539 = vmatprep.subr.bf16.mxu1 %v3152_v8 }
 0x299   : > { %2512 = vmatpush1.bf16.msra.mxu0 %v3327_v22  ;;  %2541 = vmatpush3.bf16.msra.mxu1 %v3348_v44 }
 0x29a   : > { %2514 = vmatprep.subr.bf16.mxu0 %v3330_v24  ;;  %2542 = vmatprep.subr.bf16.mxu1 %v3152_v8 }
 0x29d   : > { %2516 = vmatpush1.bf16.msra.mxu0 %v3335_v33  ;;  %2544 = vmatpush3.bf16.msra.mxu1 %v3358_v53 }
 0x29e   : > { %2518 = vmatprep.subr.bf16.mxu0 %v3341_v36  ;;  %2545 = vmatprep.subr.bf16.mxu1 %v3152_v8 }
 0x2a1   : > { %2520 = vmatpush1.bf16.msra.mxu0 %v3345_v42  ;;  %2547 = vmatpush3.bf16.msra.mxu1 %v3368_v62 }
 0x2a2   : > { %2522 = vmatprep.subr.bf16.mxu0 %v3351_v45  ;;  %2548 = vmatprep.subr.bf16.mxu1 %v3152_v8 }
 0x2a5   : > { %2524 = vmatpush1.bf16.msra.mxu0 %v3355_v51  ;;  %2550 = vmatpush3.bf16.msra.mxu1 %v3378_v5 }
 0x2a6   : > { %2526 = vmatprep.subr.bf16.mxu0 %v3361_v54  ;;  %2551 = vmatprep.subr.bf16.mxu1 %v3152_v8 }
 0x2a9   : > { %2528 = vmatpush1.bf16.msra.mxu0 %v3365_v60  ;;  %2553 = vmatpush3.bf16.msra.mxu1 %v3386_v13 }
 0x2aa   : > { %2530 = vmatprep.subr.bf16.mxu0 %v3371_v63  ;;  %2554 = vmatprep.subr.bf16.mxu1 %v3152_v8 }
 0x2ad   : > { %2532 = vmatpush1.bf16.msra.mxu0 %v3375_v3  ;;  %2556 = vmatpush3.bf16.msra.mxu1 %v3392_v18 }
 0x2ae   : > { %2558 = vmatprep.subr.bf16.mxu0 %v3309_v4  ;;  %2589 = vmatprep.subr.bf16.mxu1 %v3152_v8 }
 0x363   : > { %v650_v43 = vpop.f32.mrb[4].mxu0  ;;  %v721_v46 = vpop.f32.mrb[4].mxu1 }
 0x364   : > { %v725_v47 = vadd.f32 %v1827_v41, %v650_v43  ;;  %v652_v48 = vpop.f32.mrb[5].mxu0  ;;  %v2122_v49 = vpop.f32.mrb[5].mxu1  ;;  %v739_v61 = vadd.f32 %v3435_v37, %v721_v46 }
 0x365   : > { %v726_v55 = vadd.f32 %v1828_v52, %v652_v48  ;;  %v1834_v48 = vld [vmem:[%s3278_s13 + $0x58] sm:$0xff] }
 0x366   : > { %v1830_v50 = vmul.f32 -1.442695, %v725_v47 }
 0x367   : > { %v1831_v56 = vmul.f32 -1.442695, %v726_v55 }
 0x368   : > { %2902 = vpow2.f32 %v1830_v50 }
 0x369   : > { %2904 = vpow2.f32 %v1831_v56 }
 0x372   : > { %v2903_v57 = vpop.eup %2902 }
 0x373   : > { %v733_v58 = vadd.f32 1.0, %v2903_v57  ;;  %v2905_v59 = vpop.eup %2904  ;;  %v921_v57 = vstv %s920_s8 }
 0x374   : > { %v734_v7 = vadd.f32 1.0, %v2905_v59  ;;  %vm922_vm4 = vcmp.eq.s32.totalorder %v921_v57, 1 }
 0x375   : > { %2906 = vrcp.f32 %v733_v58 }
 0x37f   : > { %v2907_v0 = vpop.eup %2906 }
 0x380   : > { %v740_v2 = vmul.f32 %v2907_v0, %v739_v61 }
 0x382   : > { %v741_v6 = vadd.f32 %v1829_v1, %v740_v2  ;;  %v1837_v1 = vld [vmem:[%s3278_s13 + $0x60] sm:$0xff] }
 0x384   : > { %2908 = vtanh.f32 %v741_v6 }
 0x385   : > { %2910 = vrcp.f32 %v734_v7 }
 0x38e   : > { %v2909_v12 = vpop.eup %2908 }
 0x38f   : > { %v743_v14 = vsub.f32 %v3491_v40, %v2909_v12  ;;  %v2911_v19 = vpop.eup %2910 }
 0x391   : > { %v744_v20 = vmul.f32 %v2911_v19, %v743_v14  ;;  %v1838_v19 = vld [vmem:[%s3278_s13 + $0x68] sm:$0xff] }
 0x393   : > { %v745_v21 = vadd.f32 %v2909_v12, %v744_v20 }
 0x395   : > { %v3537_v23 = vsel %vm750_vm3, %v745_v21, %v3491_v40 }
 0x396   : > { %821 = vmatmul.mubr.f32.vlgmr.msra.gmra.mrb[6].mxu0 %v3537_v23  ;;  %2156 = vmatmul.mubr.f32.vlgmr.msra.gmra.mrb[6].mxu1 %v3537_v23 }
 0x397   : > { %2560 = vmatpush1.bf16.msra.mxu0 %v3313_v10  ;;  %2591 = vmatpush3.bf16.msra.mxu1 %v3332_v30 }
 0x398   : > { %2562 = vmatprep.subr.bf16.mxu0 %v3315_v11  ;;  %2592 = vmatprep.subr.bf16.mxu1 %v3152_v8 }
 0x399   : > { %992 = vmatprep.mubr.f32.mxu0 %v3153_v9  ;;  %2190 = vmatprep.mubr.msk.f32.mxu1 %vm3154_vm0, %v3153_v9 }
 0x39b   : > { %2564 = vmatpush1.bf16.msra.mxu0 %v3321_v16  ;;  %2594 = vmatpush3.bf16.msra.mxu1 %v3338_v35 }
 0x39c   : > { %2566 = vmatprep.subr.bf16.mxu0 %v3324_v17  ;;  %2595 = vmatprep.subr.bf16.mxu1 %v3152_v8 }
 0x39f   : > { %2568 = vmatpush1.bf16.msra.mxu0 %v3327_v22  ;;  %2597 = vmatpush3.bf16.msra.mxu1 %v3348_v44 }
 0x3a0   : > { %2570 = vmatprep.subr.bf16.mxu0 %v3330_v24  ;;  %2598 = vmatprep.subr.bf16.mxu1 %v3152_v8 }
 0x3a3   : > { %2572 = vmatpush1.bf16.msra.mxu0 %v3335_v33  ;;  %2600 = vmatpush3.bf16.msra.mxu1 %v3358_v53 }
 0x3a4   : > { %2574 = vmatprep.subr.bf16.mxu0 %v3341_v36  ;;  %2601 = vmatprep.subr.bf16.mxu1 %v3152_v8 }
 0x3a7   : > { %2576 = vmatpush1.bf16.msra.mxu0 %v3345_v42  ;;  %2603 = vmatpush3.bf16.msra.mxu1 %v3368_v62 }
 0x3a8   : > { %2578 = vmatprep.subr.bf16.mxu0 %v3351_v45  ;;  %2604 = vmatprep.subr.bf16.mxu1 %v3152_v8 }
 0x3ab   : > { %2580 = vmatpush1.bf16.msra.mxu0 %v3355_v51  ;;  %2606 = vmatpush3.bf16.msra.mxu1 %v3378_v5 }
 0x3ac   : > { %2582 = vmatprep.subr.bf16.mxu0 %v3361_v54  ;;  %2607 = vmatprep.subr.bf16.mxu1 %v3152_v8 }
 0x3af   : > { %2584 = vmatpush1.bf16.msra.mxu0 %v3365_v60  ;;  %2609 = vmatpush3.bf16.msra.mxu1 %v3386_v13 }
 0x3b0   : > { %2586 = vmatprep.subr.bf16.mxu0 %v3371_v63  ;;  %2610 = vmatprep.subr.bf16.mxu1 %v3152_v8 }
 0x3b3   : > { %2588 = vmatpush1.bf16.msra.mxu0 %v3375_v3  ;;  %2612 = vmatpush3.bf16.msra.mxu1 %v3392_v18 }
 0x3b4   : > { %2614 = vmatprep.subr.bf16.mxu0 %v3309_v4  ;;  %2645 = vmatprep.subr.bf16.mxu1 %v3152_v8 }
 0x469   : > { %v822_v26 = vpop.f32.mrb[6].mxu0  ;;  %v893_v27 = vpop.f32.mrb[6].mxu1 }
 0x46a   : > { %v897_v28 = vadd.f32 %v1832_v25, %v822_v26  ;;  %v824_v29 = vpop.f32.mrb[7].mxu0  ;;  %v2157_v31 = vpop.f32.mrb[7].mxu1  ;;  %v911_v46 = vadd.f32 %v3435_v37, %v893_v27 }
 0x46b   : > { %v898_v38 = vadd.f32 %v1833_v34, %v824_v29  ;;  %v1839_v29 = vld [vmem:[%s3278_s13 + $0x70] sm:$0xff] }
 0x46c   : > { %v1835_v32 = vmul.f32 -1.442695, %v897_v28 }
 0x46d   : > { %v1836_v39 = vmul.f32 -1.442695, %v898_v38 }
 0x46e   : > { %2912 = vpow2.f32 %v1835_v32 }
 0x46f   : > { %2914 = vpow2.f32 %v1836_v39 }
 0x478   : > { %v2913_v40 = vpop.eup %2912 }
 0x479   : > { %v905_v41 = vadd.f32 1.0, %v2913_v40  ;;  %v2915_v43 = vpop.eup %2914  ;;  %v1093_v40 = vstv %s1092_s12 }
 0x47a   : > { %v906_v52 = vadd.f32 1.0, %v2915_v43  ;;  %vm1094_vm5 = vcmp.eq.s32.totalorder %v1093_v40, 1 }
 0x47b   : > { %2916 = vrcp.f32 %v905_v41 }
 0x485   : > { %v2917_v47 = vpop.eup %2916 }
 0x486   : > { %v912_v49 = vmul.f32 %v2917_v47, %v911_v46 }
 0x488   : > { %v913_v50 = vadd.f32 %v1834_v48, %v912_v49  ;;  %v1842_v48 = vld [vmem:[%s3278_s13 + $0x78] sm:$0xff] }
 0x48a   : > { %2918 = vtanh.f32 %v913_v50 }
 0x48b   : > { %2920 = vrcp.f32 %v906_v52 }
 0x494   : > { %v2919_v55 = vpop.eup %2918 }
 0x495   : > { %v915_v56 = vsub.f32 %v3537_v23, %v2919_v55  ;;  %v2921_v58 = vpop.eup %2920 }
 0x497   : > { %v916_v59 = vmul.f32 %v2921_v58, %v915_v56  ;;  %v1843_v58 = vld [vmem:[%s3278_s13 + $0x80] sm:$0xff] }
 0x499   : > { %v917_v61 = vadd.f32 %v2919_v55, %v916_v59 }
 0x49b   : > { %v3583_v0 = vsel %vm922_vm4, %v917_v61, %v3537_v23 }
 0x49c   : > { %993 = vmatmul.mubr.f32.vlgmr.msra.gmra.mrb[8].mxu0 %v3583_v0  ;;  %2191 = vmatmul.mubr.f32.vlgmr.msra.gmra.mrb[8].mxu1 %v3583_v0 }
 0x49d   : > { %2616 = vmatpush1.bf16.msra.mxu0 %v3313_v10  ;;  %2647 = vmatpush3.bf16.msra.mxu1 %v3332_v30 }
 0x49e   : > { %2618 = vmatprep.subr.bf16.mxu0 %v3315_v11  ;;  %2648 = vmatprep.subr.bf16.mxu1 %v3152_v8 }
 0x49f   : > { %1164 = vmatprep.mubr.f32.mxu0 %v3153_v9  ;;  %2225 = vmatprep.mubr.msk.f32.mxu1 %vm3154_vm0, %v3153_v9 }
 0x4a1   : > { %2620 = vmatpush1.bf16.msra.mxu0 %v3321_v16  ;;  %2650 = vmatpush3.bf16.msra.mxu1 %v3338_v35 }
 0x4a2   : > { %2622 = vmatprep.subr.bf16.mxu0 %v3324_v17  ;;  %2651 = vmatprep.subr.bf16.mxu1 %v3152_v8 }
 0x4a5   : > { %2624 = vmatpush1.bf16.msra.mxu0 %v3327_v22  ;;  %2653 = vmatpush3.bf16.msra.mxu1 %v3348_v44 }
 0x4a6   : > { %2626 = vmatprep.subr.bf16.mxu0 %v3330_v24  ;;  %2654 = vmatprep.subr.bf16.mxu1 %v3152_v8 }
 0x4a9   : > { %2628 = vmatpush1.bf16.msra.mxu0 %v3335_v33  ;;  %2656 = vmatpush3.bf16.msra.mxu1 %v3358_v53 }
 0x4aa   : > { %2630 = vmatprep.subr.bf16.mxu0 %v3341_v36  ;;  %2657 = vmatprep.subr.bf16.mxu1 %v3152_v8 }
 0x4ad   : > { %2632 = vmatpush1.bf16.msra.mxu0 %v3345_v42  ;;  %2659 = vmatpush3.bf16.msra.mxu1 %v3368_v62 }
 0x4ae   : > { %2634 = vmatprep.subr.bf16.mxu0 %v3351_v45  ;;  %2660 = vmatprep.subr.bf16.mxu1 %v3152_v8 }
 0x4b1   : > { %2636 = vmatpush1.bf16.msra.mxu0 %v3355_v51  ;;  %2662 = vmatpush3.bf16.msra.mxu1 %v3378_v5 }
 0x4b2   : > { %2638 = vmatprep.subr.bf16.mxu0 %v3361_v54  ;;  %2663 = vmatprep.subr.bf16.mxu1 %v3152_v8 }
 0x4b5   : > { %2640 = vmatpush1.bf16.msra.mxu0 %v3365_v60  ;;  %2665 = vmatpush3.bf16.msra.mxu1 %v3386_v13 }
 0x4b6   : > { %2642 = vmatprep.subr.bf16.mxu0 %v3371_v63  ;;  %2666 = vmatprep.subr.bf16.mxu1 %v3152_v8 }
 0x4b9   : > { %2644 = vmatpush1.bf16.msra.mxu0 %v3375_v3  ;;  %2668 = vmatpush3.bf16.msra.mxu1 %v3392_v18 }
 0x4ba   : > { %2670 = vmatprep.subr.bf16.mxu0 %v3309_v4  ;;  %2701 = vmatprep.subr.bf16.mxu1 %v3152_v8 }
 0x56f   : > { %v994_v2 = vpop.f32.mrb[8].mxu0  ;;  %v1065_v6 = vpop.f32.mrb[8].mxu1 }
 0x570   : > { %v1069_v7 = vadd.f32 %v1837_v1, %v994_v2  ;;  %v996_v12 = vpop.f32.mrb[9].mxu0  ;;  %v2192_v14 = vpop.f32.mrb[9].mxu1  ;;  %v1083_v27 = vadd.f32 %v3435_v37, %v1065_v6 }
 0x571   : > { %v1070_v20 = vadd.f32 %v1838_v19, %v996_v12 }
 0x572   : > { %v1840_v15 = vmul.f32 -1.442695, %v1069_v7  ;;  %v1844_v7 = vld [vmem:[%s3278_s13 + $0x88] sm:$0xff] }
 0x573   : > { %v1841_v21 = vmul.f32 -1.442695, %v1070_v20 }
 0x574   : > { %2922 = vpow2.f32 %v1840_v15 }
 0x575   : > { %2924 = vpow2.f32 %v1841_v21  ;;  %v1265_v21 = vstv %s1264_s9 }
 0x576   : > { %vm1266_vm6 = vcmp.eq.s32.totalorder %v1265_v21, 1 }
 0x57e   : > { %v2923_v23 = vpop.eup %2922 }
 0x57f   : > { %v1077_v25 = vadd.f32 1.0, %v2923_v23  ;;  %v2925_v26 = vpop.eup %2924 }
 0x580   : > { %v1078_v34 = vadd.f32 1.0, %v2925_v26 }
 0x581   : > { %2926 = vrcp.f32 %v1077_v25 }
 0x58b   : > { %v2927_v28 = vpop.eup %2926 }
 0x58c   : > { %v1084_v31 = vmul.f32 %v2927_v28, %v1083_v27 }
 0x58e   : > { %v1085_v32 = vadd.f32 %v1839_v29, %v1084_v31  ;;  %v1852_v29 = vld [vmem:[%s3278_s13 + $0xa8] sm:$0xff] }
 0x590   : > { %2928 = vtanh.f32 %v1085_v32 }
 0x591   : > { %2930 = vrcp.f32 %v1078_v34 }
 0x59a   : > { %v2929_v38 = vpop.eup %2928 }
 0x59b   : > { %v1087_v39 = vsub.f32 %v3583_v0, %v2929_v38  ;;  %v2931_v41 = vpop.eup %2930 }
 0x59d   : > { %v1088_v43 = vmul.f32 %v2931_v41, %v1087_v39  ;;  %v1853_v41 = vld [vmem:[%s3278_s13 + $0xb0] sm:$0xff] }
 0x59f   : > { %v1089_v46 = vadd.f32 %v2929_v38, %v1088_v43 }
 0x5a1   : > { %v3629_v47 = vsel %vm1094_vm5, %v1089_v46, %v3583_v0 }
 0x5a2   : > { %1165 = vmatmul.mubr.f32.vlgmr.msra.gmra.mrb[10].mxu0 %v3629_v47  ;;  %2226 = vmatmul.mubr.f32.vlgmr.msra.gmra.mrb[10].mxu1 %v3629_v47 }
 0x5a3   : > { %2672 = vmatpush1.bf16.msra.mxu0 %v3313_v10  ;;  %2703 = vmatpush3.bf16.msra.mxu1 %v3332_v30 }
 0x5a4   : > { %2674 = vmatprep.subr.bf16.mxu0 %v3315_v11  ;;  %2704 = vmatprep.subr.bf16.mxu1 %v3152_v8 }
 0x5a5   : > { %1336 = vmatprep.mubr.f32.mxu0 %v3153_v9  ;;  %2260 = vmatprep.mubr.msk.f32.mxu1 %vm3154_vm0, %v3153_v9 }
 0x5a7   : > { %2676 = vmatpush1.bf16.msra.mxu0 %v3321_v16  ;;  %2706 = vmatpush3.bf16.msra.mxu1 %v3338_v35 }
 0x5a8   : > { %2678 = vmatprep.subr.bf16.mxu0 %v3324_v17  ;;  %2707 = vmatprep.subr.bf16.mxu1 %v3152_v8 }
 0x5ab   : > { %2680 = vmatpush1.bf16.msra.mxu0 %v3327_v22  ;;  %2709 = vmatpush3.bf16.msra.mxu1 %v3348_v44 }
 0x5ac   : > { %2682 = vmatprep.subr.bf16.mxu0 %v3330_v24  ;;  %2710 = vmatprep.subr.bf16.mxu1 %v3152_v8 }
 0x5af   : > { %2684 = vmatpush1.bf16.msra.mxu0 %v3335_v33  ;;  %2712 = vmatpush3.bf16.msra.mxu1 %v3358_v53 }
 0x5b0   : > { %2686 = vmatprep.subr.bf16.mxu0 %v3341_v36  ;;  %2713 = vmatprep.subr.bf16.mxu1 %v3152_v8 }
 0x5b3   : > { %2688 = vmatpush1.bf16.msra.mxu0 %v3345_v42  ;;  %2715 = vmatpush3.bf16.msra.mxu1 %v3368_v62 }
 0x5b4   : > { %2690 = vmatprep.subr.bf16.mxu0 %v3351_v45  ;;  %2716 = vmatprep.subr.bf16.mxu1 %v3152_v8 }
 0x5b7   : > { %2692 = vmatpush1.bf16.msra.mxu0 %v3355_v51  ;;  %2718 = vmatpush3.bf16.msra.mxu1 %v3378_v5 }
 0x5b8   : > { %2694 = vmatprep.subr.bf16.mxu0 %v3361_v54  ;;  %2719 = vmatprep.subr.bf16.mxu1 %v3152_v8 }
 0x5bb   : > { %2696 = vmatpush1.bf16.msra.mxu0 %v3365_v60  ;;  %2721 = vmatpush3.bf16.msra.mxu1 %v3386_v13 }
 0x5bc   : > { %2698 = vmatprep.subr.bf16.mxu0 %v3371_v63  ;;  %2722 = vmatprep.subr.bf16.mxu1 %v3152_v8 }
 0x5bf   : > { %2700 = vmatpush1.bf16.msra.mxu0 %v3375_v3  ;;  %2724 = vmatpush3.bf16.msra.mxu1 %v3392_v18 }
 0x5c0   : > { %2726 = vmatprep.subr.bf16.mxu0 %v3309_v4  ;;  %2757 = vmatprep.subr.bf16.mxu1 %v3152_v8 }
 0x675   : > { %v1166_v49 = vpop.f32.mrb[10].mxu0  ;;  %v1237_v50 = vpop.f32.mrb[10].mxu1 }
 0x676   : > { %v1241_v52 = vadd.f32 %v1842_v48, %v1166_v49  ;;  %v1168_v55 = vpop.f32.mrb[11].mxu0  ;;  %v2227_v56 = vpop.f32.mrb[11].mxu1  ;;  %v1255_v2 = vadd.f32 %v3435_v37, %v1237_v50 }
 0x677   : > { %v1242_v59 = vadd.f32 %v1843_v58, %v1168_v55  ;;  %v1854_v55 = vld [vmem:[%s3278_s13 + $0xb8] sm:$0xff] }
 0x678   : > { %v1845_v57 = vmul.f32 -1.442695, %v1241_v52 }
 0x679   : > { %v1846_v61 = vmul.f32 -1.442695, %v1242_v59 }
 0x67a   : > { %2932 = vpow2.f32 %v1845_v57 }
 0x67b   : > { %2934 = vpow2.f32 %v1846_v61 }
 0x684   : > { %v2933_v0 = vpop.eup %2932 }
 0x685   : > { %v1249_v1 = vadd.f32 1.0, %v2933_v0  ;;  %v2935_v4 = vpop.eup %2934  ;;  %v1609_v0 = vstv %s1608_s15 }
 0x686   : > { %v1250_v15 = vadd.f32 1.0, %v2935_v4  ;;  %vm1610_vm8 = vcmp.eq.s32.totalorder %v1609_v0, 1 }
 0x687   : > { %2936 = vrcp.f32 %v1249_v1 }
 0x691   : > { %v2937_v6 = vpop.eup %2936 }
 0x692   : > { %v1256_v12 = vmul.f32 %v2937_v6, %v1255_v2 }
 0x694   : > { %v1257_v14 = vadd.f32 %v1844_v7, %v1256_v12 }
 0x696   : > { %2938 = vtanh.f32 %v1257_v14 }
 0x697   : > { %2940 = vrcp.f32 %v1250_v15 }
 0x6a0   : > { %v2939_v19 = vpop.eup %2938 }
 0x6a1   : > { %v1259_v20 = vsub.f32 %v3629_v47, %v2939_v19  ;;  %v2941_v23 = vpop.eup %2940 }
 0x6a3   : > { %v1260_v25 = vmul.f32 %v2941_v23, %v1259_v20 }
 0x6a5   : > { %v1261_v26 = vadd.f32 %v2939_v19, %v1260_v25 }
 0x6a7   : > { %v3675_v27 = vsel %vm1266_vm6, %v1261_v26, %v3629_v47 }
 0x6a8   : > { %1337 = vmatmul.mubr.f32.vlgmr.msra.gmra.mrb[12].mxu0 %v3675_v27  ;;  %2261 = vmatmul.mubr.f32.vlgmr.msra.gmra.mrb[12].mxu1 %v3675_v27 }
 0x6a9   : > { %2728 = vmatpush1.bf16.msra.mxu0 %v3313_v10  ;;  %2759 = vmatpush3.bf16.msra.mxu1 %v3332_v30  ;;  %v1848_v30 = vld [vmem:[%s3278_s13 + $0x98] sm:$0xff] }
 0x6aa   : > { %2730 = vmatprep.subr.bf16.mxu0 %v3315_v11  ;;  %2760 = vmatprep.subr.bf16.mxu1 %v3152_v8 }
 0x6ab   : > { %1508 = vmatprep.mubr.f32.mxu0 %v3153_v9  ;;  %2295 = vmatprep.mubr.msk.f32.mxu1 %vm3154_vm0, %v3153_v9  ;;  %v1847_v9 = vld [vmem:[%s3278_s13 + $0x90] sm:$0xff] }
 0x6ad   : > { %2732 = vmatpush1.bf16.msra.mxu0 %v3321_v16  ;;  %2762 = vmatpush3.bf16.msra.mxu1 %v3338_v35 }
 0x6ae   : > { %2734 = vmatprep.subr.bf16.mxu0 %v3324_v17  ;;  %2763 = vmatprep.subr.bf16.mxu1 %v3152_v8 }
 0x6b1   : > { %2736 = vmatpush1.bf16.msra.mxu0 %v3327_v22  ;;  %2765 = vmatpush3.bf16.msra.mxu1 %v3348_v44 }
 0x6b2   : > { %2738 = vmatprep.subr.bf16.mxu0 %v3330_v24  ;;  %2766 = vmatprep.subr.bf16.mxu1 %v3152_v8 }
 0x6b5   : > { %2740 = vmatpush1.bf16.msra.mxu0 %v3335_v33  ;;  %2768 = vmatpush3.bf16.msra.mxu1 %v3358_v53 }
 0x6b6   : > { %2742 = vmatprep.subr.bf16.mxu0 %v3341_v36  ;;  %2769 = vmatprep.subr.bf16.mxu1 %v3152_v8 }
 0x6b9   : > { %2744 = vmatpush1.bf16.msra.mxu0 %v3345_v42  ;;  %2771 = vmatpush3.bf16.msra.mxu1 %v3368_v62 }
 0x6ba   : > { %2746 = vmatprep.subr.bf16.mxu0 %v3351_v45  ;;  %2772 = vmatprep.subr.bf16.mxu1 %v3152_v8 }
 0x6bd   : > { %2748 = vmatpush1.bf16.msra.mxu0 %v3355_v51  ;;  %2774 = vmatpush3.bf16.msra.mxu1 %v3378_v5  ;;  %v1849_v51 = vld [vmem:[%s3278_s13 + $0xa0] sm:$0xff] }
 0x6be   : > { %2750 = vmatprep.subr.bf16.mxu0 %v3361_v54  ;;  %2775 = vmatprep.subr.bf16.mxu1 %v3152_v8 }
 0x6c1   : > { %2752 = vmatpush1.bf16.msra.mxu0 %v3365_v60  ;;  %2777 = vmatpush3.bf16.msra.mxu1 %v3386_v13 }
 0x6c2   : > { %2754 = vmatprep.subr.bf16.mxu0 %v3371_v63  ;;  %2778 = vmatprep.subr.bf16.mxu1 %v3152_v8 }
 0x6c5   : > { %2756 = vmatpush1.bf16.msra.mxu0 %v3375_v3  ;;  %2780 = vmatpush3.bf16.msra.mxu1 %v3392_v18  ;;  %v1437_v3 = vstv %s1436_s14 }
 0x6c6   : > { %vm1438_vm7 = vcmp.eq.s32.totalorder %v1437_v3, 1 }
 0x77b   : > { %v1338_v10 = vpop.f32.mrb[12].mxu0  ;;  %v1409_v11 = vpop.f32.mrb[12].mxu1 }
 0x77c   : > { %v1413_v16 = vadd.f32 %v1847_v9, %v1338_v10  ;;  %v1340_v17 = vpop.f32.mrb[13].mxu0  ;;  %v2262_v22 = vpop.f32.mrb[13].mxu1  ;;  %v1427_v44 = vadd.f32 %v3435_v37, %v1409_v11 }
 0x77d   : > { %v1414_v33 = vadd.f32 %v1848_v30, %v1340_v17 }
 0x77e   : > { %v1850_v24 = vmul.f32 -1.442695, %v1413_v16 }
 0x77f   : > { %v1851_v35 = vmul.f32 -1.442695, %v1414_v33 }
 0x780   : > { %2942 = vpow2.f32 %v1850_v24 }
 0x781   : > { %2944 = vpow2.f32 %v1851_v35 }
 0x78a   : > { %v2943_v36 = vpop.eup %2942 }
 0x78b   : > { %v1421_v42 = vadd.f32 1.0, %v2943_v36  ;;  %v2945_v8 = vpop.eup %2944 }
 0x78c   : > { %v1422_v60 = vadd.f32 1.0, %v2945_v8 }
 0x78d   : > { %2946 = vrcp.f32 %v1421_v42 }
 0x797   : > { %v2947_v45 = vpop.eup %2946 }
 0x798   : > { %v1428_v53 = vmul.f32 %v2947_v45, %v1427_v44 }
 0x79a   : > { %v1429_v54 = vadd.f32 %v1849_v51, %v1428_v53 }
 0x79c   : > { %2948 = vtanh.f32 %v1429_v54 }
 0x79d   : > { %2950 = vrcp.f32 %v1422_v60 }
 0x7a6   : > { %v2949_v62 = vpop.eup %2948 }
 0x7a7   : > { %v1431_v63 = vsub.f32 %v3675_v27, %v2949_v62  ;;  %v2951_v5 = vpop.eup %2950 }
 0x7a9   : > { %v1432_v13 = vmul.f32 %v2951_v5, %v1431_v63 }
 0x7ab   : > { %v1433_v18 = vadd.f32 %v2949_v62, %v1432_v13 }
 0x7ad   : > { %v1439_v28 = vsel %vm1438_vm7, %v1433_v18, %v3675_v27 }
 0x7ae   : > { %1509 = vmatmul.mubr.f32.vlgmr.msra.gmra.mrb[14].mxu0 %v1439_v28  ;;  %2296 = vmatmul.mubr.f32.vlgmr.msra.gmra.mrb[14].mxu1 %v1439_v28 }
 0x881   : > { %v1510_v31 = vpop.f32.mrb[14].mxu0  ;;  %v1581_v32 = vpop.f32.mrb[14].mxu1 }
 0x882   : > { %v1585_v34 = vadd.f32 %v1852_v29, %v1510_v31  ;;  %v1512_v38 = vpop.f32.mrb[15].mxu0  ;;  %v2297_v39 = vpop.f32.mrb[15].mxu1  ;;  %v1599_v50 = vadd.f32 %v3435_v37, %v1581_v32 }
 0x883   : > { %v1586_v43 = vadd.f32 %v1853_v41, %v1512_v38 }
 0x884   : > { %v1855_v40 = vmul.f32 -1.442695, %v1585_v34 }
 0x885   : > { %v1856_v46 = vmul.f32 -1.442695, %v1586_v43 }
 0x886   : > { %2952 = vpow2.f32 %v1855_v40 }
 0x887   : > { %2954 = vpow2.f32 %v1856_v46 }
 0x890   : > { %v2953_v47 = vpop.eup %2952 }
 0x891   : > { %v1593_v48 = vadd.f32 1.0, %v2953_v47  ;;  %v2955_v49 = vpop.eup %2954 }
 0x892   : > { %v1594_v58 = vadd.f32 1.0, %v2955_v49 }
 0x893   : > { %2956 = vrcp.f32 %v1593_v48 }
 0x89d   : > { %v2957_v52 = vpop.eup %2956 }
 0x89e   : > { %v1600_v56 = vmul.f32 %v2957_v52, %v1599_v50 }
 0x8a0   : > { %v1601_v57 = vadd.f32 %v1854_v55, %v1600_v56 }
 0x8a2   : > { %2958 = vtanh.f32 %v1601_v57 }
 0x8a3   : > { %2960 = vrcp.f32 %v1594_v58 }
 0x8ac   : > { %v2959_v59 = vpop.eup %2958 }
 0x8ad   : > { %v1603_v61 = vsub.f32 %v1439_v28, %v2959_v59  ;;  %v2961_v1 = vpop.eup %2960 }
 0x8ae   : > { %1616 = sbr.rel (%p1857_p11) target bundleno = 2495 (0x9bf), region = 46 }
 0x8af   : > { %v1604_v4 = vmul.f32 %v2961_v1, %v1603_v61 }
 0x8b1   : > { %v1605_v2 = vadd.f32 %v2959_v59, %v1604_v4 }
 0x8b3   : > { %v1611_v6 = vsel %vm1610_vm8, %v1605_v2, %v1439_v28 }
 0x8b4   : > { %1612 = vst [vmem:[#allocation2] sm:$0xff] %v1611_v6 }
 0x8b5   : > { %s3155_s13 = smov [#allocation5]   ;;  %s3036_s25 = scalar_lea.hbm %s3786_s3, 2048 }
 0x8b6   : > { %s1624_s23 = sshll.u32 %s3155_s13, 4  ;;  %p3037_p13 = scmp.ne.s32.totalorder %s3786_s3, %s3036_s25  ;;  %s1625_s23 = int_to_ptr.vmem [resolvable:$true] %s1624_s23 }
 0x8b7   : > { %p3040_p3 = scmp.lt.u32.totalorder %s3036_s25, %s3786_s3 }
 0x8b9   : > { %p3042_p4 = pnand %p3040_p3, %p3037_p13 }
 0x8bb   : > { %3045 = shalt.err (!%p3042_p4)  }
 0x8bc   : > { %s3046_s8 = scalar_lea.vmem %s1625_s23, 2048  ;;  %p3051_p7 = scmp.lt.s32.totalorder %s1625_s23, %s1625_s23 }
 0x8bd   : > { %p3047_p9 = scmp.ne.s32.totalorder %s1625_s23, %s3046_s8  ;;  %p3052_p5 = scmp.lt.s32.totalorder %s3046_s8, %s3046_s8 }
 0x8bf   : > { %p3053_p6 = por %p3052_p5, %p3051_p7 }
 0x8c1   : > { %p3054_p8 = pnand %p3053_p6, %p3047_p9 }
 0x8c3   : > { %3057 = shalt.err (!%p3054_p8)  }
 0x8c4   : > { %1627 = dma.hbm_to_vmem [thread:$0]  %s3786_s3, 2048, %s1625_s23, [#allocation18] }
 0x8c5   : > { %3116 = dma.done.wait [#allocation18], 2048 }
 0x8c6   : > { %3117 = vsyncadd [#allocation18], 4294965248  ;;  %v1646_v37 = vld [vmem:[#allocation5] sm:$0xff]  ;;  %v1647_v7 = vld [vmem:[#allocation5 + $0x8] sm:$0xff]  ;;  %v3156_v14 = vmov 0.0|0.0   ;;  %vm3157_vm9 = vmmov 0  }
 0x8c7   : > { %v1648_v12 = vld [vmem:[#allocation5 + $0x10] sm:$0xff]  ;;  %2781 = vmatprep.subr.bf16.mxu0 %v3156_v14  ;;  %v2782_v15 = vpack.c.bf16 %v1647_v7, %v1646_v37  ;;  %v1649_v19 = vld [vmem:[#allocation5 + $0x18] sm:$0xff]  ;;  %v3158_v20 = vmov 0.0   ;;  %v1650_v23 = vld [vmem:[#allocation5 + $0x20] sm:$0xff] }
 0x8c8   : > { %2330 = vmatprep.mubr.msk.f32.mxu0 %vm3157_vm9, %v3158_v20  ;;  %v2785_v21 = vpack.c.bf16 %v1649_v19, %v1648_v12  ;;  %v1651_v25 = vld [vmem:[#allocation5 + $0x28] sm:$0xff]  ;;  %v1652_v27 = vld [vmem:[#allocation5 + $0x30] sm:$0xff]  ;;  %v1653_v9 = vld [vmem:[#allocation5 + $0x38] sm:$0xff] }
 0x8c9   : > { %2783 = vmatpush3.bf16.msra.mxu0 %v2782_v15  ;;  %v2788_v26 = vpack.c.bf16 %v1651_v25, %v1650_v23  ;;  %v2791_v10 = vpack.c.bf16 %v1653_v9, %v1652_v27  ;;  %v1654_v11 = vld [vmem:[#allocation5 + $0x40] sm:$0xff]  ;;  %v1655_v16 = vld [vmem:[#allocation5 + $0x48] sm:$0xff]  ;;  %v1656_v22 = vld [vmem:[#allocation5 + $0x50] sm:$0xff] }
 0x8ca   : > { %2784 = vmatprep.subr.bf16.mxu0 %v3156_v14  ;;  %v2794_v17 = vpack.c.bf16 %v1655_v16, %v1654_v11  ;;  %v1657_v24 = vld [vmem:[#allocation5 + $0x58] sm:$0xff]  ;;  %v1634_v35 = vld [vmem:[#allocation2] sm:$0xff]  ;;  %v1658_v36 = vld [vmem:[#allocation5 + $0x60] sm:$0xff] }
 0x8cb   : > { %v2797_v30 = vpack.c.bf16 %v1657_v24, %v1656_v22  ;;  %v1858_v33 = vld [vmem:[#allocation4 + $0x1] ss:$0 sm:$0xff]  ;;  %v1659_v42 = vld [vmem:[#allocation5 + $0x68] sm:$0xff]  ;;  %v1859_v45 = vld [vmem:[#allocation4 + $0x2] ss:$0 sm:$0xff] }
 0x8cc   : > { %v1639_v8 = vmul.f32 %v1858_v33, %v1634_v35  ;;  %v2800_v44 = vpack.c.bf16 %v1659_v42, %v1658_v36  ;;  %v1660_v51 = vld [vmem:[#allocation5 + $0x70] sm:$0xff]  ;;  %v1661_v53 = vld [vmem:[#allocation5 + $0x78] sm:$0xff] }
 0x8cd   : > { %2786 = vmatpush3.bf16.msra.mxu0 %v2785_v21  ;;  %v2803_v60 = vpack.c.bf16 %v1661_v53, %v1660_v51  ;;  %v1860_v63 = vld [vmem:[#allocation4 + $0x3] ss:$0 sm:$0xff] }
 0x8ce   : > { %2787 = vmatprep.subr.bf16.mxu0 %v3156_v14  ;;  %v1644_v54 = vadd.f32 %v1859_v45, %v1639_v8 }
 0x8d0   : > { %v1645_v62 = vmax.f32 %v1644_v54, 0.0 }
 0x8d1   : > { %2789 = vmatpush3.bf16.msra.mxu0 %v2788_v26 }
 0x8d2   : > { %2790 = vmatprep.subr.bf16.mxu0 %v3156_v14 }
 0x8d5   : > { %2792 = vmatpush3.bf16.msra.mxu0 %v2791_v10 }
 0x8d6   : > { %2793 = vmatprep.subr.bf16.mxu0 %v3156_v14 }
 0x8d9   : > { %2795 = vmatpush3.bf16.msra.mxu0 %v2794_v17 }
 0x8da   : > { %2796 = vmatprep.subr.bf16.mxu0 %v3156_v14 }
 0x8dd   : > { %2798 = vmatpush3.bf16.msra.mxu0 %v2797_v30 }
 0x8de   : > { %2799 = vmatprep.subr.bf16.mxu0 %v3156_v14 }
 0x8e1   : > { %2801 = vmatpush3.bf16.msra.mxu0 %v2800_v44 }
 0x8e2   : > { %2802 = vmatprep.subr.bf16.mxu0 %v3156_v14 }
 0x8e5   : > { %2804 = vmatpush3.bf16.msra.mxu0 %v2803_v60 }
 0x8e8   : > { %2331 = vmatmul.mubr.f32.vlgmr.msra.gmra.mrb[0].mxu0 %v1645_v62 }
 0x9bb   : > { %v1732_v3 = vpop.f32.mrb[0].mxu0 }
 0x9bc   : > { %v1733_v5 = vadd.f32 %v1860_v63, %v1732_v3  ;;  %v2332_v13 = vpop.f32.mrb[1].mxu0 }
 0x9be   : > { %1736 = vst [vmem:[#allocation9] sm:$0xff] %v1733_v5 }
 0x9bf PF: > { %p3739_p10 = scmp.eq.s32.totalorder %s1810_s21, 1  ;;  %s3159_s6 = smov [#allocation9]  }
 0x9c0   : > { %s1746_s9 = sshll.u32 %s3159_s6, 4  ;;  %s1747_s9 = int_to_ptr.vmem [resolvable:$true] %s1746_s9 }
 0x9c1   : > { %s3058_s10 = scalar_lea.vmem %s1747_s9, 128  ;;  %p3065_p2 = scmp.lt.s32.totalorder %s1747_s9, %s1747_s9 }
 0x9c2   : > { %p3059_p12 = scmp.ne.s32.totalorder %s1747_s9, %s3058_s10  ;;  %p3066_p11 = scmp.lt.s32.totalorder %s3058_s10, %s3058_s10 }
 0x9c4   : > { %p3060_p0 = pnand %p3059_p12, %p3739_p10  ;;  %p3067_p13 = por %p3066_p11, %p3065_p2 }
 0x9c6   : > { %p3061_p1 = pneg %p3060_p0 }
 0x9c8   : > { %p3068_p3 = pnand %p3067_p13, %p3061_p1 }
 0x9ca   : > { %3071 = shalt.err (!%p3068_p3)
}
 0x9cb   : > { %s3072_s21 = scalar_lea.hbm %s3787_s4, 128 }
 0x9cc   : > { %p3073_p4 = scmp.ne.s32.totalorder %s3787_s4, %s3072_s21  ;;  %p3078_p5 = scmp.lt.u32.totalorder %s3072_s21, %s3787_s4 }
 0x9ce   : > { %p3074_p9 = pnand %p3073_p4, %p3739_p10 }
 0x9d0   : > { %p3075_p7 = pneg %p3074_p9 }
 0x9d2   : > { %p3080_p6 = pnand %p3078_p5, %p3075_p7 }
 0x9d4   : > { %3083 = shalt.err (!%p3080_p6)
}
 0x9d5   : > { %2811 = dma.vmem_to_hbm [thread:$0]  (%p3739_p10), %s1747_s9, 128, %s3787_s4, [#allocation8]  }
 0x9d6   : > { %3119 = dma.done.wait (%p3739_p10), [#allocation8], 128  }
 0x9d7   : > { %3121 = vsyncadd (%p3739_p10), [#allocation8], 4294967168 }
 0x9d8 PF: > { %s18_s20 = sadd.s32 1, %s3144_s20   ;;  %s3791_s15 = smov %s3128_s16 }
 0x9d9   : > { %p15_p8 = scmp.ge.s32.totalorder %s18_s20, 4   ;;  %s3792_s16 = smov %s3132_s17 }
 0x9da   : > { %s3793_s17 = smov %s3232_s26  ;;  %s3794_s18 = smov %s3140_s19 }
 0x9db   : > { %s3795_s19 = smov %s3797_s22  ;;  %17 = sbr.rel (!%p15_p8) target bundleno = 5 (0x5), region = 92 }
 0x9e2   :  { %1759 = vsyncpa [#allocation7], 1 }
 0x9e3   :  { %1761 = vsyncpa [#allocation7 + $0x1], 1 }
 0x9e4   :  { %1762 = vsyncpa [#allocation8], 1 }
 0x9e5   :  { %1764 = vsyncpa [#allocation8 + $0x1], 1 }

</bundles_post_ra>
